<compile_context>
chip_gen: v6e
topology: v6e:2x2x1
jax: 0.10.0
libtpu: 0.0.40
codegen_flags: <defaults>
</compile_context>

<pallas_src>
import functools

import jax
import jax.numpy as jnp
import numpy as np
from jax.experimental import pallas as pl
from jax.experimental.pallas import tpu as pltpu


def _pick_block(dim, target):
    """Largest block <= target that tiles `dim` and satisfies TPU blocking
    (block == full dim, or a multiple of 8 that divides dim)."""
    if dim <= target:
        return dim
    for cand in range(target, 0, -1):
        if dim % cand == 0 and cand % 8 == 0:
            return cand
    return dim


# ----------------------------------------------------------------------------
# Fused kernel: per-block input projection + unrolled LSTM recurrence
# ----------------------------------------------------------------------------
def _lstm_fused_kernel(x_ref, h0_ref, c0_ref, wih_ref, whh_ref, b_ref,
                       out_ref, hn_ref, cn_ref,
                       h_scr, c_scr,
                       *, hidden_size, block_T, matmul_dtype):
    tb = pl.program_id(1)
    n_tb = pl.num_programs(1)
    H = hidden_size

    # Initial hidden/cell state for this batch block, loaded on the first
    # time block only (time is the innermost / fastest grid axis).
    @pl.when(tb == 0)
    def _():
        h_scr[...] = h0_ref[...].astype(jnp.float32)
        c_scr[...] = c0_ref[...].astype(jnp.float32)

    h = h_scr[...]                     # (bB, H) f32 carry
    c = c_scr[...]                     # (bB, H) f32 carry
    w_ih = wih_ref[...]                # (D, 4H)  matmul-dtype, hoisted load
    w_hh = whh_ref[...]                # (H, 4H)  matmul-dtype, hoisted load
    bias = b_ref[...]                  # (1, 4H)  f32 fused bias row

    # Hoisted input projection for the whole time block: bT independent 2-D
    # MXU matmuls with no dependence on the h->h chain, so they interleave
    # with (and hide under) the latency-bound recurrent matmuls below.
    gx = [
        jnp.dot(x_ref[:, i, :].astype(matmul_dtype), w_ih,
                preferred_element_type=jnp.float32) + bias
        for i in range(block_T)
    ]

    # Fully-unrolled recurrence: static indices -> static slices and stores.
    for i in range(block_T):
        rec = jnp.dot(h.astype(matmul_dtype), w_hh,
                      preferred_element_type=jnp.float32)
        gates = gx[i] + rec            # (bB, 4H) f32

        ig = jax.nn.sigmoid(gates[:, 0 * H:1 * H])
        fg = jax.nn.sigmoid(gates[:, 1 * H:2 * H])
        gg = jnp.tanh(gates[:, 2 * H:3 * H])
        og = jax.nn.sigmoid(gates[:, 3 * H:4 * H])

        c = fg * c + ig * gg
        h = og * jnp.tanh(c)
        out_ref[:, i, :] = h.astype(out_ref.dtype)

    # Persist the carry for the next time block of this batch block.
    h_scr[...] = h
    c_scr[...] = c

    # Final states: written once, on the last time block only.
    @pl.when(tb == n_tb - 1)
    def _():
        hn_ref[...] = h.astype(hn_ref.dtype)
        cn_ref[...] = c.astype(cn_ref.dtype)


# ----------------------------------------------------------------------------
# Module-facing wrapper (mirrors EncoderLSTM.forward)
# ----------------------------------------------------------------------------
def encoder_lstm_forward(x, hidden, params, *, block_T=8, block_B=256,
                         matmul_dtype=jnp.bfloat16):
    """Returns (output, (h_n, c_n)) with PyTorch nn.LSTM (batch_first) semantics."""
    h0, c0 = hidden                      # each (1, B, H)
    w_ih, w_hh, b_ih, b_hh = params      # PyTorch shapes: (4H,D), (4H,H), (4H,), (4H,)
    B, T, D = x.shape
    H = h0.shape[-1]
    G = 4 * H

    wih_t = jnp.transpose(w_ih).astype(matmul_dtype)         # (D, 4H)
    whh_t = jnp.transpose(w_hh).astype(matmul_dtype)         # (H, 4H)
    bias = (b_ih + b_hh).reshape(1, G).astype(jnp.float32)   # fused bias row

    bT = _pick_block(T, block_T)
    bB = _pick_block(B, block_B)
    nb, nt = B // bB, T // bT

    kernel = functools.partial(_lstm_fused_kernel, hidden_size=H,
                               block_T=bT, matmul_dtype=matmul_dtype)

    out, h_n, c_n = pl.pallas_call(
        kernel,
        out_shape=(
            jax.ShapeDtypeStruct((B, T, H), x.dtype),
            jax.ShapeDtypeStruct((B, H), x.dtype),
            jax.ShapeDtypeStruct((B, H), x.dtype),
        ),
        grid_spec=pltpu.PrefetchScalarGridSpec(
            num_scalar_prefetch=0,
            grid=(nb, nt),
            in_specs=[
                pl.BlockSpec((bB, bT, D), lambda b, t: (b, t, 0)),  # x block
                pl.BlockSpec((bB, H), lambda b, t: (b, 0)),         # h0
                pl.BlockSpec((bB, H), lambda b, t: (b, 0)),         # c0
                pl.BlockSpec((D, G), lambda b, t: (0, 0)),          # W_ih^T
                pl.BlockSpec((H, G), lambda b, t: (0, 0)),          # W_hh^T
                pl.BlockSpec((1, G), lambda b, t: (0, 0)),          # fused bias
            ],
            out_specs=[
                pl.BlockSpec((bB, bT, H), lambda b, t: (b, t, 0)),  # output block
                pl.BlockSpec((bB, H), lambda b, t: (b, 0)),         # h_n
                pl.BlockSpec((bB, H), lambda b, t: (b, 0)),         # c_n
            ],
            scratch_shapes=[
                pltpu.VMEM((bB, H), jnp.float32),                   # h carry
                pltpu.VMEM((bB, H), jnp.float32),                   # c carry
            ],
        ),
        compiler_params=pltpu.CompilerParams(
            dimension_semantics=("parallel", "arbitrary")),          # batch || , time seq
    )(x, h0[0], c0[0], wih_t, whh_t, bias)

    return out, (h_n[None, ...], c_n[None, ...])


# ----------------------------------------------------------------------------
# Pure-JAX reference (PyTorch nn.LSTM semantics) for validation
# ----------------------------------------------------------------------------
def _reference_lstm(x, hidden, params):
    h0, c0 = hidden
    w_ih, w_hh, b_ih, b_hh = params
    H = h0.shape[-1]
    b = b_ih + b_hh

    def step(carry, x_t):
        h, c = carry
        gates = x_t @ w_ih.T + h @ w_hh.T + b
        i = jax.nn.sigmoid(gates[:, 0 * H:1 * H])
        f = jax.nn.sigmoid(gates[:, 1 * H:2 * H])
        g = jnp.tanh(gates[:, 2 * H:3 * H])
        o = jax.nn.sigmoid(gates[:, 3 * H:4 * H])
        c = f * c + i * g
        h = o * jnp.tanh(c)
        return (h, c), h

    (h_n, c_n), out_tm = jax.lax.scan(step, (h0[0], c0[0]),
                                      jnp.transpose(x, (1, 0, 2)))
    return jnp.transpose(out_tm, (1, 0, 2)), (h_n[None], c_n[None])


if __name__ == "__main__":
    B, T, D_IN, H = 2, 16, 16, 32          # T=16 with block_T=8 -> 2 time blocks
    key = jax.random.PRNGKey(0)
    kx, kh, kc, k1, k2, k3, k4 = jax.random.split(key, 7)

    x = jax.random.normal(kx, (B, T, D_IN), dtype=jnp.float32)
    h0 = 0.5 * jax.random.normal(kh, (1, B, H), dtype=jnp.float32)
    c0 = 0.5 * jax.random.normal(kc, (1, B, H), dtype=jnp.float32)

    # Deterministic parameter init, PyTorch-style U(-1/sqrt(H), 1/sqrt(H)).
    bound = 1.0 / np.sqrt(H)
    w_ih = jax.random.uniform(k1, (4 * H, D_IN), minval=-bound, maxval=bound)
    w_hh = jax.random.uniform(k2, (4 * H, H), minval=-bound, maxval=bound)
    b_ih = jax.random.uniform(k3, (4 * H,), minval=-bound, maxval=bound)
    b_hh = jax.random.uniform(k4, (4 * H,), minval=-bound, maxval=bound)
    params = (w_ih, w_hh, b_ih, b_hh)

    out_exp, (h_exp, c_exp) = _reference_lstm(x, (h0, c0), params)

    # f32-operand path: should match the pure-f32 reference tightly.
    out32, (hn32, cn32) = encoder_lstm_forward(x, (h0, c0), params,
                                               matmul_dtype=jnp.float32)
    jax.block_until_ready((out32, hn32, cn32))
    np.testing.assert_allclose(np.asarray(out32), np.asarray(out_exp), atol=1e-5, rtol=1e-5)
    np.testing.assert_allclose(np.asarray(hn32), np.asarray(h_exp), atol=1e-5, rtol=1e-5)
    np.testing.assert_allclose(np.asarray(cn32), np.asarray(c_exp), atol=1e-5, rtol=1e-5)

    # Default bf16-operand / f32-accumulate path (MXU-native): looser tolerance.
    out_bf, (hn_bf, cn_bf) = encoder_lstm_forward(x, (h0, c0), params)
    jax.block_until_ready((out_bf, hn_bf, cn_bf))
    assert out_bf.shape == (B, T, H) and hn_bf.shape == (1, B, H) and cn_bf.shape == (1, B, H)
    np.testing.assert_allclose(np.asarray(out_bf), np.asarray(out_exp), atol=3e-2, rtol=3e-2)
    np.testing.assert_allclose(np.asarray(hn_bf), np.asarray(h_exp), atol=3e-2, rtol=3e-2)
    np.testing.assert_allclose(np.asarray(cn_bf), np.asarray(c_exp), atol=3e-2, rtol=3e-2)

    print("KERNEL_OK")
</pallas_src>

<mosaic_0001>
module attributes {stable_mosaic.version = 11 : i64} {
  func.func @_lstm_fused_kernel(%arg0: i32, %arg1: i32, %arg2: memref<2x8x16xf32, #tpu.memory_space<vmem>>, %arg3: memref<2x32xf32, #tpu.memory_space<vmem>>, %arg4: memref<2x32xf32, #tpu.memory_space<vmem>>, %arg5: memref<16x128xf32, #tpu.memory_space<vmem>>, %arg6: memref<32x128xf32, #tpu.memory_space<vmem>>, %arg7: memref<1x128xf32, #tpu.memory_space<vmem>>, %arg8: memref<2x8x32xf32, #tpu.memory_space<vmem>>, %arg9: memref<2x32xf32, #tpu.memory_space<vmem>>, %arg10: memref<2x32xf32, #tpu.memory_space<vmem>>, %arg11: memref<2x32xf32, #tpu.memory_space<vmem>>, %arg12: memref<2x32xf32, #tpu.memory_space<vmem>>) attributes {dimension_semantics = [#tpu.dimension_semantics<parallel>, #tpu.dimension_semantics<arbitrary>], iteration_bounds = array<i64: 1, 2>, scalar_prefetch = 0 : i64, scratch_operands = 2 : i64, tpu.core_type = #tpu.core_type<tc>, window_params = [{transform_indices = @transform_0, window_bounds = array<i64: 2, 8, 16>}, {transform_indices = @transform_1, window_bounds = array<i64: 2, 32>}, {transform_indices = @transform_2, window_bounds = array<i64: 2, 32>}, {pipeline_mode = #tpu.pipeline_mode<synchronous>, transform_indices = @transform_3, window_bounds = array<i64: 16, 128>}, {pipeline_mode = #tpu.pipeline_mode<synchronous>, transform_indices = @transform_4, window_bounds = array<i64: 32, 128>}, {pipeline_mode = #tpu.pipeline_mode<synchronous>, transform_indices = @transform_5, window_bounds = array<i64: 1, 128>}, {transform_indices = @transform_6, window_bounds = array<i64: 2, 8, 32>}, {transform_indices = @transform_7, window_bounds = array<i64: 2, 32>}, {transform_indices = @transform_8, window_bounds = array<i64: 2, 32>}]} {
    %c0_i32 = arith.constant 0 : i32
    %0 = arith.cmpi eq, %arg1, %c0_i32 : i32
    %1 = arith.extui %0 : i1 to i32
    %c0_i32_0 = arith.constant 0 : i32
    %2 = arith.cmpi ne, %1, %c0_i32_0 : i32
    scf.if %2 {
      %c0_95 = arith.constant 0 : index
      %c0_96 = arith.constant 0 : index
      %293 = vector.load %arg3[%c0_95, %c0_96] : memref<2x32xf32, #tpu.memory_space<vmem>>, vector<2x32xf32>
      %c0_97 = arith.constant 0 : index
      %c0_98 = arith.constant 0 : index
      %294 = vector.load %arg11[%c0_97, %c0_98] : memref<2x32xf32, #tpu.memory_space<vmem>>, vector<2x32xf32>
      tpu.vector_store %arg11[%c0_97, %c0_98], %293 {strides = array<i32>} : memref<2x32xf32, #tpu.memory_space<vmem>>, vector<2x32xf32>,
      %c0_99 = arith.constant 0 : index
      %c0_100 = arith.constant 0 : index
      %295 = vector.load %arg4[%c0_99, %c0_100] : memref<2x32xf32, #tpu.memory_space<vmem>>, vector<2x32xf32>
      %c0_101 = arith.constant 0 : index
      %c0_102 = arith.constant 0 : index
      %296 = vector.load %arg12[%c0_101, %c0_102] : memref<2x32xf32, #tpu.memory_space<vmem>>, vector<2x32xf32>
      tpu.vector_store %arg12[%c0_101, %c0_102], %295 {strides = array<i32>} : memref<2x32xf32, #tpu.memory_space<vmem>>, vector<2x32xf32>,
    } else {
    }
    %c0 = arith.constant 0 : index
    %c0_1 = arith.constant 0 : index
    %3 = vector.load %arg11[%c0, %c0_1] : memref<2x32xf32, #tpu.memory_space<vmem>>, vector<2x32xf32>
    %c0_2 = arith.constant 0 : index
    %c0_3 = arith.constant 0 : index
    %4 = vector.load %arg12[%c0_2, %c0_3] : memref<2x32xf32, #tpu.memory_space<vmem>>, vector<2x32xf32>
    %c0_4 = arith.constant 0 : index
    %c0_5 = arith.constant 0 : index
    %5 = vector.load %arg5[%c0_4, %c0_5] : memref<16x128xf32, #tpu.memory_space<vmem>>, vector<16x128xf32>
    %c0_6 = arith.constant 0 : index
    %c0_7 = arith.constant 0 : index
    %6 = vector.load %arg6[%c0_6, %c0_7] : memref<32x128xf32, #tpu.memory_space<vmem>>, vector<32x128xf32>
    %c0_8 = arith.constant 0 : index
    %c0_9 = arith.constant 0 : index
    %7 = vector.load %arg7[%c0_8, %c0_9] : memref<1x128xf32, #tpu.memory_space<vmem>>, vector<1x128xf32>
    %c0_10 = arith.constant 0 : index
    %c0_11 = arith.constant 0 : index
    %c0_12 = arith.constant 0 : index
    %8 = vector.load %arg2[%c0_10, %c0_11, %c0_12] : memref<2x8x16xf32, #tpu.memory_space<vmem>>, vector<2x1x16xf32>
    %9 = vector.shape_cast %8 : vector<2x1x16xf32> to vector<2x16xf32>
    %cst = arith.constant dense<0.000000e+00> : vector<2x128xf32>
    %10 = tpu.matmul %9, %5, %cst {dimension_numbers = #tpu.dot_dimension_numbers<[1], [0], [0], [1], [0, 0, 1, 1], [], []>} : vector<2x16xf32>, vector<16x128xf32>, vector<2x128xf32> -> vector<2x128xf32>
    %11 = vector.broadcast %7 : vector<1x128xf32> to vector<2x128xf32>
    %12 = arith.addf %10, %11 : vector<2x128xf32>
    %c0_13 = arith.constant 0 : index
    %c1 = arith.constant 1 : index
    %c0_14 = arith.constant 0 : index
    %13 = vector.load %arg2[%c0_13, %c1, %c0_14] : memref<2x8x16xf32, #tpu.memory_space<vmem>>, vector<2x1x16xf32>
    %14 = vector.shape_cast %13 : vector<2x1x16xf32> to vector<2x16xf32>
    %cst_15 = arith.constant dense<0.000000e+00> : vector<2x128xf32>
    %15 = tpu.matmul %14, %5, %cst_15 {dimension_numbers = #tpu.dot_dimension_numbers<[1], [0], [0], [1], [0, 0, 1, 1], [], []>} : vector<2x16xf32>, vector<16x128xf32>, vector<2x128xf32> -> vector<2x128xf32>
    %16 = vector.broadcast %7 : vector<1x128xf32> to vector<2x128xf32>
    %17 = arith.addf %15, %16 : vector<2x128xf32>
    %c0_16 = arith.constant 0 : index
    %c2 = arith.constant 2 : index
    %c0_17 = arith.constant 0 : index
    %18 = vector.load %arg2[%c0_16, %c2, %c0_17] : memref<2x8x16xf32, #tpu.memory_space<vmem>>, vector<2x1x16xf32>
    %19 = vector.shape_cast %18 : vector<2x1x16xf32> to vector<2x16xf32>
    %cst_18 = arith.constant dense<0.000000e+00> : vector<2x128xf32>
    %20 = tpu.matmul %19, %5, %cst_18 {dimension_numbers = #tpu.dot_dimension_numbers<[1], [0], [0], [1], [0, 0, 1, 1], [], []>} : vector<2x16xf32>, vector<16x128xf32>, vector<2x128xf32> -> vector<2x128xf32>
    %21 = vector.broadcast %7 : vector<1x128xf32> to vector<2x128xf32>
    %22 = arith.addf %20, %21 : vector<2x128xf32>
    %c0_19 = arith.constant 0 : index
    %c3 = arith.constant 3 : index
    %c0_20 = arith.constant 0 : index
    %23 = vector.load %arg2[%c0_19, %c3, %c0_20] : memref<2x8x16xf32, #tpu.memory_space<vmem>>, vector<2x1x16xf32>
    %24 = vector.shape_cast %23 : vector<2x1x16xf32> to vector<2x16xf32>
    %cst_21 = arith.constant dense<0.000000e+00> : vector<2x128xf32>
    %25 = tpu.matmul %24, %5, %cst_21 {dimension_numbers = #tpu.dot_dimension_numbers<[1], [0], [0], [1], [0, 0, 1, 1], [], []>} : vector<2x16xf32>, vector<16x128xf32>, vector<2x128xf32> -> vector<2x128xf32>
    %26 = vector.broadcast %7 : vector<1x128xf32> to vector<2x128xf32>
    %27 = arith.addf %25, %26 : vector<2x128xf32>
    %c0_22 = arith.constant 0 : index
    %c4 = arith.constant 4 : index
    %c0_23 = arith.constant 0 : index
    %28 = vector.load %arg2[%c0_22, %c4, %c0_23] : memref<2x8x16xf32, #tpu.memory_space<vmem>>, vector<2x1x16xf32>
    %29 = vector.shape_cast %28 : vector<2x1x16xf32> to vector<2x16xf32>
    %cst_24 = arith.constant dense<0.000000e+00> : vector<2x128xf32>
    %30 = tpu.matmul %29, %5, %cst_24 {dimension_numbers = #tpu.dot_dimension_numbers<[1], [0], [0], [1], [0, 0, 1, 1], [], []>} : vector<2x16xf32>, vector<16x128xf32>, vector<2x128xf32> -> vector<2x128xf32>
    %31 = vector.broadcast %7 : vector<1x128xf32> to vector<2x128xf32>
    %32 = arith.addf %30, %31 : vector<2x128xf32>
    %c0_25 = arith.constant 0 : index
    %c5 = arith.constant 5 : index
    %c0_26 = arith.constant 0 : index
    %33 = vector.load %arg2[%c0_25, %c5, %c0_26] : memref<2x8x16xf32, #tpu.memory_space<vmem>>, vector<2x1x16xf32>
    %34 = vector.shape_cast %33 : vector<2x1x16xf32> to vector<2x16xf32>
    %cst_27 = arith.constant dense<0.000000e+00> : vector<2x128xf32>
    %35 = tpu.matmul %34, %5, %cst_27 {dimension_numbers = #tpu.dot_dimension_numbers<[1], [0], [0], [1], [0, 0, 1, 1], [], []>} : vector<2x16xf32>, vector<16x128xf32>, vector<2x128xf32> -> vector<2x128xf32>
    %36 = vector.broadcast %7 : vector<1x128xf32> to vector<2x128xf32>
    %37 = arith.addf %35, %36 : vector<2x128xf32>
    %c0_28 = arith.constant 0 : index
    %c6 = arith.constant 6 : index
    %c0_29 = arith.constant 0 : index
    %38 = vector.load %arg2[%c0_28, %c6, %c0_29] : memref<2x8x16xf32, #tpu.memory_space<vmem>>, vector<2x1x16xf32>
    %39 = vector.shape_cast %38 : vector<2x1x16xf32> to vector<2x16xf32>
    %cst_30 = arith.constant dense<0.000000e+00> : vector<2x128xf32>
    %40 = tpu.matmul %39, %5, %cst_30 {dimension_numbers = #tpu.dot_dimension_numbers<[1], [0], [0], [1], [0, 0, 1, 1], [], []>} : vector<2x16xf32>, vector<16x128xf32>, vector<2x128xf32> -> vector<2x128xf32>
    %41 = vector.broadcast %7 : vector<1x128xf32> to vector<2x128xf32>
    %42 = arith.addf %40, %41 : vector<2x128xf32>
    %c0_31 = arith.constant 0 : index
    %c7 = arith.constant 7 : index
    %c0_32 = arith.constant 0 : index
    %43 = vector.load %arg2[%c0_31, %c7, %c0_32] : memref<2x8x16xf32, #tpu.memory_space<vmem>>, vector<2x1x16xf32>
    %44 = vector.shape_cast %43 : vector<2x1x16xf32> to vector<2x16xf32>
    %cst_33 = arith.constant dense<0.000000e+00> : vector<2x128xf32>
    %45 = tpu.matmul %44, %5, %cst_33 {dimension_numbers = #tpu.dot_dimension_numbers<[1], [0], [0], [1], [0, 0, 1, 1], [], []>} : vector<2x16xf32>, vector<16x128xf32>, vector<2x128xf32> -> vector<2x128xf32>
    %46 = vector.broadcast %7 : vector<1x128xf32> to vector<2x128xf32>
    %47 = arith.addf %45, %46 : vector<2x128xf32>
    %cst_34 = arith.constant dense<0.000000e+00> : vector<2x128xf32>
    %48 = tpu.matmul %3, %6, %cst_34 {dimension_numbers = #tpu.dot_dimension_numbers<[1], [0], [0], [1], [0, 0, 1, 1], [], []>} : vector<2x32xf32>, vector<32x128xf32>, vector<2x128xf32> -> vector<2x128xf32>
    %49 = arith.addf %12, %48 : vector<2x128xf32>
    %50 = vector.extract_strided_slice %49 {offsets = [0, 0], sizes = [2, 32], strides = [1, 1]} : vector<2x128xf32> to vector<2x32xf32>
    %51 = arith.negf %50 : vector<2x32xf32>
    %52 = math.exp %51 : vector<2x32xf32>
    %cst_35 = arith.constant 1.000000e+00 : f32
    %53 = vector.broadcast %cst_35 : f32 to vector<2x32xf32>
    %54 = arith.addf %53, %52 : vector<2x32xf32>
    %55 = arith.divf %53, %54 : vector<2x32xf32>
    %56 = vector.extract_strided_slice %49 {offsets = [0, 32], sizes = [2, 32], strides = [1, 1]} : vector<2x128xf32> to vector<2x32xf32>
    %57 = arith.negf %56 : vector<2x32xf32>
    %58 = math.exp %57 : vector<2x32xf32>
    %cst_36 = arith.constant 1.000000e+00 : f32
    %59 = vector.broadcast %cst_36 : f32 to vector<2x32xf32>
    %60 = arith.addf %59, %58 : vector<2x32xf32>
    %61 = arith.divf %59, %60 : vector<2x32xf32>
    %62 = vector.extract_strided_slice %49 {offsets = [0, 64], sizes = [2, 32], strides = [1, 1]} : vector<2x128xf32> to vector<2x32xf32>
    %63 = math.tanh %62 : vector<2x32xf32>
    %64 = vector.extract_strided_slice %49 {offsets = [0, 96], sizes = [2, 32], strides = [1, 1]} : vector<2x128xf32> to vector<2x32xf32>
    %65 = arith.negf %64 : vector<2x32xf32>
    %66 = math.exp %65 : vector<2x32xf32>
    %cst_37 = arith.constant 1.000000e+00 : f32
    %67 = vector.broadcast %cst_37 : f32 to vector<2x32xf32>
    %68 = arith.addf %67, %66 : vector<2x32xf32>
    %69 = arith.divf %67, %68 : vector<2x32xf32>
    %70 = arith.mulf %61, %4 : vector<2x32xf32>
    %71 = arith.mulf %55, %63 : vector<2x32xf32>
    %72 = arith.addf %70, %71 : vector<2x32xf32>
    %73 = math.tanh %72 : vector<2x32xf32>
    %74 = arith.mulf %69, %73 : vector<2x32xf32>
    %c0_38 = arith.constant 0 : index
    %c0_39 = arith.constant 0 : index
    %c0_40 = arith.constant 0 : index
    %75 = vector.load %arg8[%c0_38, %c0_39, %c0_40] : memref<2x8x32xf32, #tpu.memory_space<vmem>>, vector<2x1x32xf32>
    %76 = vector.shape_cast %75 : vector<2x1x32xf32> to vector<2x32xf32>
    %77 = vector.shape_cast %74 : vector<2x32xf32> to vector<2x1x32xf32>
    tpu.vector_store %arg8[%c0_38, %c0_39, %c0_40], %77 {strides = array<i32>} : memref<2x8x32xf32, #tpu.memory_space<vmem>>, vector<2x1x32xf32>,
    %cst_41 = arith.constant dense<0.000000e+00> : vector<2x128xf32>
    %78 = tpu.matmul %74, %6, %cst_41 {dimension_numbers = #tpu.dot_dimension_numbers<[1], [0], [0], [1], [0, 0, 1, 1], [], []>} : vector<2x32xf32>, vector<32x128xf32>, vector<2x128xf32> -> vector<2x128xf32>
    %79 = arith.addf %17, %78 : vector<2x128xf32>
    %80 = vector.extract_strided_slice %79 {offsets = [0, 0], sizes = [2, 32], strides = [1, 1]} : vector<2x128xf32> to vector<2x32xf32>
    %81 = arith.negf %80 : vector<2x32xf32>
    %82 = math.exp %81 : vector<2x32xf32>
    %cst_42 = arith.constant 1.000000e+00 : f32
    %83 = vector.broadcast %cst_42 : f32 to vector<2x32xf32>
    %84 = arith.addf %83, %82 : vector<2x32xf32>
    %85 = arith.divf %83, %84 : vector<2x32xf32>
    %86 = vector.extract_strided_slice %79 {offsets = [0, 32], sizes = [2, 32], strides = [1, 1]} : vector<2x128xf32> to vector<2x32xf32>
    %87 = arith.negf %86 : vector<2x32xf32>
    %88 = math.exp %87 : vector<2x32xf32>
    %cst_43 = arith.constant 1.000000e+00 : f32
    %89 = vector.broadcast %cst_43 : f32 to vector<2x32xf32>
    %90 = arith.addf %89, %88 : vector<2x32xf32>
    %91 = arith.divf %89, %90 : vector<2x32xf32>
    %92 = vector.extract_strided_slice %79 {offsets = [0, 64], sizes = [2, 32], strides = [1, 1]} : vector<2x128xf32> to vector<2x32xf32>
    %93 = math.tanh %92 : vector<2x32xf32>
    %94 = vector.extract_strided_slice %79 {offsets = [0, 96], sizes = [2, 32], strides = [1, 1]} : vector<2x128xf32> to vector<2x32xf32>
    %95 = arith.negf %94 : vector<2x32xf32>
    %96 = math.exp %95 : vector<2x32xf32>
    %cst_44 = arith.constant 1.000000e+00 : f32
    %97 = vector.broadcast %cst_44 : f32 to vector<2x32xf32>
    %98 = arith.addf %97, %96 : vector<2x32xf32>
    %99 = arith.divf %97, %98 : vector<2x32xf32>
    %100 = arith.mulf %91, %72 : vector<2x32xf32>
    %101 = arith.mulf %85, %93 : vector<2x32xf32>
    %102 = arith.addf %100, %101 : vector<2x32xf32>
    %103 = math.tanh %102 : vector<2x32xf32>
    %104 = arith.mulf %99, %103 : vector<2x32xf32>
    %c0_45 = arith.constant 0 : index
    %c1_46 = arith.constant 1 : index
    %c0_47 = arith.constant 0 : index
    %105 = vector.load %arg8[%c0_45, %c1_46, %c0_47] : memref<2x8x32xf32, #tpu.memory_space<vmem>>, vector<2x1x32xf32>
    %106 = vector.shape_cast %105 : vector<2x1x32xf32> to vector<2x32xf32>
    %107 = vector.shape_cast %104 : vector<2x32xf32> to vector<2x1x32xf32>
    tpu.vector_store %arg8[%c0_45, %c1_46, %c0_47], %107 {strides = array<i32>} : memref<2x8x32xf32, #tpu.memory_space<vmem>>, vector<2x1x32xf32>,
    %cst_48 = arith.constant dense<0.000000e+00> : vector<2x128xf32>
    %108 = tpu.matmul %104, %6, %cst_48 {dimension_numbers = #tpu.dot_dimension_numbers<[1], [0], [0], [1], [0, 0, 1, 1], [], []>} : vector<2x32xf32>, vector<32x128xf32>, vector<2x128xf32> -> vector<2x128xf32>
    %109 = arith.addf %22, %108 : vector<2x128xf32>
    %110 = vector.extract_strided_slice %109 {offsets = [0, 0], sizes = [2, 32], strides = [1, 1]} : vector<2x128xf32> to vector<2x32xf32>
    %111 = arith.negf %110 : vector<2x32xf32>
    %112 = math.exp %111 : vector<2x32xf32>
    %cst_49 = arith.constant 1.000000e+00 : f32
    %113 = vector.broadcast %cst_49 : f32 to vector<2x32xf32>
    %114 = arith.addf %113, %112 : vector<2x32xf32>
    %115 = arith.divf %113, %114 : vector<2x32xf32>
    %116 = vector.extract_strided_slice %109 {offsets = [0, 32], sizes = [2, 32], strides = [1, 1]} : vector<2x128xf32> to vector<2x32xf32>
    %117 = arith.negf %116 : vector<2x32xf32>
    %118 = math.exp %117 : vector<2x32xf32>
    %cst_50 = arith.constant 1.000000e+00 : f32
    %119 = vector.broadcast %cst_50 : f32 to vector<2x32xf32>
    %120 = arith.addf %119, %118 : vector<2x32xf32>
    %121 = arith.divf %119, %120 : vector<2x32xf32>
    %122 = vector.extract_strided_slice %109 {offsets = [0, 64], sizes = [2, 32], strides = [1, 1]} : vector<2x128xf32> to vector<2x32xf32>
    %123 = math.tanh %122 : vector<2x32xf32>
    %124 = vector.extract_strided_slice %109 {offsets = [0, 96], sizes = [2, 32], strides = [1, 1]} : vector<2x128xf32> to vector<2x32xf32>
    %125 = arith.negf %124 : vector<2x32xf32>
    %126 = math.exp %125 : vector<2x32xf32>
    %cst_51 = arith.constant 1.000000e+00 : f32
    %127 = vector.broadcast %cst_51 : f32 to vector<2x32xf32>
    %128 = arith.addf %127, %126 : vector<2x32xf32>
    %129 = arith.divf %127, %128 : vector<2x32xf32>
    %130 = arith.mulf %121, %102 : vector<2x32xf32>
    %131 = arith.mulf %115, %123 : vector<2x32xf32>
    %132 = arith.addf %130, %131 : vector<2x32xf32>
    %133 = math.tanh %132 : vector<2x32xf32>
    %134 = arith.mulf %129, %133 : vector<2x32xf32>
    %c0_52 = arith.constant 0 : index
    %c2_53 = arith.constant 2 : index
    %c0_54 = arith.constant 0 : index
    %135 = vector.load %arg8[%c0_52, %c2_53, %c0_54] : memref<2x8x32xf32, #tpu.memory_space<vmem>>, vector<2x1x32xf32>
    %136 = vector.shape_cast %135 : vector<2x1x32xf32> to vector<2x32xf32>
    %137 = vector.shape_cast %134 : vector<2x32xf32> to vector<2x1x32xf32>
    tpu.vector_store %arg8[%c0_52, %c2_53, %c0_54], %137 {strides = array<i32>} : memref<2x8x32xf32, #tpu.memory_space<vmem>>, vector<2x1x32xf32>,
    %cst_55 = arith.constant dense<0.000000e+00> : vector<2x128xf32>
    %138 = tpu.matmul %134, %6, %cst_55 {dimension_numbers = #tpu.dot_dimension_numbers<[1], [0], [0], [1], [0, 0, 1, 1], [], []>} : vector<2x32xf32>, vector<32x128xf32>, vector<2x128xf32> -> vector<2x128xf32>
    %139 = arith.addf %27, %138 : vector<2x128xf32>
    %140 = vector.extract_strided_slice %139 {offsets = [0, 0], sizes = [2, 32], strides = [1, 1]} : vector<2x128xf32> to vector<2x32xf32>
    %141 = arith.negf %140 : vector<2x32xf32>
    %142 = math.exp %141 : vector<2x32xf32>
    %cst_56 = arith.constant 1.000000e+00 : f32
    %143 = vector.broadcast %cst_56 : f32 to vector<2x32xf32>
    %144 = arith.addf %143, %142 : vector<2x32xf32>
    %145 = arith.divf %143, %144 : vector<2x32xf32>
    %146 = vector.extract_strided_slice %139 {offsets = [0, 32], sizes = [2, 32], strides = [1, 1]} : vector<2x128xf32> to vector<2x32xf32>
    %147 = arith.negf %146 : vector<2x32xf32>
    %148 = math.exp %147 : vector<2x32xf32>
    %cst_57 = arith.constant 1.000000e+00 : f32
    %149 = vector.broadcast %cst_57 : f32 to vector<2x32xf32>
    %150 = arith.addf %149, %148 : vector<2x32xf32>
    %151 = arith.divf %149, %150 : vector<2x32xf32>
    %152 = vector.extract_strided_slice %139 {offsets = [0, 64], sizes = [2, 32], strides = [1, 1]} : vector<2x128xf32> to vector<2x32xf32>
    %153 = math.tanh %152 : vector<2x32xf32>
    %154 = vector.extract_strided_slice %139 {offsets = [0, 96], sizes = [2, 32], strides = [1, 1]} : vector<2x128xf32> to vector<2x32xf32>
    %155 = arith.negf %154 : vector<2x32xf32>
    %156 = math.exp %155 : vector<2x32xf32>
    %cst_58 = arith.constant 1.000000e+00 : f32
    %157 = vector.broadcast %cst_58 : f32 to vector<2x32xf32>
    %158 = arith.addf %157, %156 : vector<2x32xf32>
    %159 = arith.divf %157, %158 : vector<2x32xf32>
    %160 = arith.mulf %151, %132 : vector<2x32xf32>
    %161 = arith.mulf %145, %153 : vector<2x32xf32>
    %162 = arith.addf %160, %161 : vector<2x32xf32>
    %163 = math.tanh %162 : vector<2x32xf32>
    %164 = arith.mulf %159, %163 : vector<2x32xf32>
    %c0_59 = arith.constant 0 : index
    %c3_60 = arith.constant 3 : index
    %c0_61 = arith.constant 0 : index
    %165 = vector.load %arg8[%c0_59, %c3_60, %c0_61] : memref<2x8x32xf32, #tpu.memory_space<vmem>>, vector<2x1x32xf32>
    %166 = vector.shape_cast %165 : vector<2x1x32xf32> to vector<2x32xf32>
    %167 = vector.shape_cast %164 : vector<2x32xf32> to vector<2x1x32xf32>
    tpu.vector_store %arg8[%c0_59, %c3_60, %c0_61], %167 {strides = array<i32>} : memref<2x8x32xf32, #tpu.memory_space<vmem>>, vector<2x1x32xf32>,
    %cst_62 = arith.constant dense<0.000000e+00> : vector<2x128xf32>
    %168 = tpu.matmul %164, %6, %cst_62 {dimension_numbers = #tpu.dot_dimension_numbers<[1], [0], [0], [1], [0, 0, 1, 1], [], []>} : vector<2x32xf32>, vector<32x128xf32>, vector<2x128xf32> -> vector<2x128xf32>
    %169 = arith.addf %32, %168 : vector<2x128xf32>
    %170 = vector.extract_strided_slice %169 {offsets = [0, 0], sizes = [2, 32], strides = [1, 1]} : vector<2x128xf32> to vector<2x32xf32>
    %171 = arith.negf %170 : vector<2x32xf32>
    %172 = math.exp %171 : vector<2x32xf32>
    %cst_63 = arith.constant 1.000000e+00 : f32
    %173 = vector.broadcast %cst_63 : f32 to vector<2x32xf32>
    %174 = arith.addf %173, %172 : vector<2x32xf32>
    %175 = arith.divf %173, %174 : vector<2x32xf32>
    %176 = vector.extract_strided_slice %169 {offsets = [0, 32], sizes = [2, 32], strides = [1, 1]} : vector<2x128xf32> to vector<2x32xf32>
    %177 = arith.negf %176 : vector<2x32xf32>
    %178 = math.exp %177 : vector<2x32xf32>
    %cst_64 = arith.constant 1.000000e+00 : f32
    %179 = vector.broadcast %cst_64 : f32 to vector<2x32xf32>
    %180 = arith.addf %179, %178 : vector<2x32xf32>
    %181 = arith.divf %179, %180 : vector<2x32xf32>
    %182 = vector.extract_strided_slice %169 {offsets = [0, 64], sizes = [2, 32], strides = [1, 1]} : vector<2x128xf32> to vector<2x32xf32>
    %183 = math.tanh %182 : vector<2x32xf32>
    %184 = vector.extract_strided_slice %169 {offsets = [0, 96], sizes = [2, 32], strides = [1, 1]} : vector<2x128xf32> to vector<2x32xf32>
    %185 = arith.negf %184 : vector<2x32xf32>
    %186 = math.exp %185 : vector<2x32xf32>
    %cst_65 = arith.constant 1.000000e+00 : f32
    %187 = vector.broadcast %cst_65 : f32 to vector<2x32xf32>
    %188 = arith.addf %187, %186 : vector<2x32xf32>
    %189 = arith.divf %187, %188 : vector<2x32xf32>
    %190 = arith.mulf %181, %162 : vector<2x32xf32>
    %191 = arith.mulf %175, %183 : vector<2x32xf32>
    %192 = arith.addf %190, %191 : vector<2x32xf32>
    %193 = math.tanh %192 : vector<2x32xf32>
    %194 = arith.mulf %189, %193 : vector<2x32xf32>
    %c0_66 = arith.constant 0 : index
    %c4_67 = arith.constant 4 : index
    %c0_68 = arith.constant 0 : index
    %195 = vector.load %arg8[%c0_66, %c4_67, %c0_68] : memref<2x8x32xf32, #tpu.memory_space<vmem>>, vector<2x1x32xf32>
    %196 = vector.shape_cast %195 : vector<2x1x32xf32> to vector<2x32xf32>
    %197 = vector.shape_cast %194 : vector<2x32xf32> to vector<2x1x32xf32>
    tpu.vector_store %arg8[%c0_66, %c4_67, %c0_68], %197 {strides = array<i32>} : memref<2x8x32xf32, #tpu.memory_space<vmem>>, vector<2x1x32xf32>,
    %cst_69 = arith.constant dense<0.000000e+00> : vector<2x128xf32>
    %198 = tpu.matmul %194, %6, %cst_69 {dimension_numbers = #tpu.dot_dimension_numbers<[1], [0], [0], [1], [0, 0, 1, 1], [], []>} : vector<2x32xf32>, vector<32x128xf32>, vector<2x128xf32> -> vector<2x128xf32>
    %199 = arith.addf %37, %198 : vector<2x128xf32>
    %200 = vector.extract_strided_slice %199 {offsets = [0, 0], sizes = [2, 32], strides = [1, 1]} : vector<2x128xf32> to vector<2x32xf32>
    %201 = arith.negf %200 : vector<2x32xf32>
    %202 = math.exp %201 : vector<2x32xf32>
    %cst_70 = arith.constant 1.000000e+00 : f32
    %203 = vector.broadcast %cst_70 : f32 to vector<2x32xf32>
    %204 = arith.addf %203, %202 : vector<2x32xf32>
    %205 = arith.divf %203, %204 : vector<2x32xf32>
    %206 = vector.extract_strided_slice %199 {offsets = [0, 32], sizes = [2, 32], strides = [1, 1]} : vector<2x128xf32> to vector<2x32xf32>
    %207 = arith.negf %206 : vector<2x32xf32>
    %208 = math.exp %207 : vector<2x32xf32>
    %cst_71 = arith.constant 1.000000e+00 : f32
    %209 = vector.broadcast %cst_71 : f32 to vector<2x32xf32>
    %210 = arith.addf %209, %208 : vector<2x32xf32>
    %211 = arith.divf %209, %210 : vector<2x32xf32>
    %212 = vector.extract_strided_slice %199 {offsets = [0, 64], sizes = [2, 32], strides = [1, 1]} : vector<2x128xf32> to vector<2x32xf32>
    %213 = math.tanh %212 : vector<2x32xf32>
    %214 = vector.extract_strided_slice %199 {offsets = [0, 96], sizes = [2, 32], strides = [1, 1]} : vector<2x128xf32> to vector<2x32xf32>
    %215 = arith.negf %214 : vector<2x32xf32>
    %216 = math.exp %215 : vector<2x32xf32>
    %cst_72 = arith.constant 1.000000e+00 : f32
    %217 = vector.broadcast %cst_72 : f32 to vector<2x32xf32>
    %218 = arith.addf %217, %216 : vector<2x32xf32>
    %219 = arith.divf %217, %218 : vector<2x32xf32>
    %220 = arith.mulf %211, %192 : vector<2x32xf32>
    %221 = arith.mulf %205, %213 : vector<2x32xf32>
    %222 = arith.addf %220, %221 : vector<2x32xf32>
    %223 = math.tanh %222 : vector<2x32xf32>
    %224 = arith.mulf %219, %223 : vector<2x32xf32>
    %c0_73 = arith.constant 0 : index
    %c5_74 = arith.constant 5 : index
    %c0_75 = arith.constant 0 : index
    %225 = vector.load %arg8[%c0_73, %c5_74, %c0_75] : memref<2x8x32xf32, #tpu.memory_space<vmem>>, vector<2x1x32xf32>
    %226 = vector.shape_cast %225 : vector<2x1x32xf32> to vector<2x32xf32>
    %227 = vector.shape_cast %224 : vector<2x32xf32> to vector<2x1x32xf32>
    tpu.vector_store %arg8[%c0_73, %c5_74, %c0_75], %227 {strides = array<i32>} : memref<2x8x32xf32, #tpu.memory_space<vmem>>, vector<2x1x32xf32>,
    %cst_76 = arith.constant dense<0.000000e+00> : vector<2x128xf32>
    %228 = tpu.matmul %224, %6, %cst_76 {dimension_numbers = #tpu.dot_dimension_numbers<[1], [0], [0], [1], [0, 0, 1, 1], [], []>} : vector<2x32xf32>, vector<32x128xf32>, vector<2x128xf32> -> vector<2x128xf32>
    %229 = arith.addf %42, %228 : vector<2x128xf32>
    %230 = vector.extract_strided_slice %229 {offsets = [0, 0], sizes = [2, 32], strides = [1, 1]} : vector<2x128xf32> to vector<2x32xf32>
    %231 = arith.negf %230 : vector<2x32xf32>
    %232 = math.exp %231 : vector<2x32xf32>
    %cst_77 = arith.constant 1.000000e+00 : f32
    %233 = vector.broadcast %cst_77 : f32 to vector<2x32xf32>
    %234 = arith.addf %233, %232 : vector<2x32xf32>
    %235 = arith.divf %233, %234 : vector<2x32xf32>
    %236 = vector.extract_strided_slice %229 {offsets = [0, 32], sizes = [2, 32], strides = [1, 1]} : vector<2x128xf32> to vector<2x32xf32>
    %237 = arith.negf %236 : vector<2x32xf32>
    %238 = math.exp %237 : vector<2x32xf32>
    %cst_78 = arith.constant 1.000000e+00 : f32
    %239 = vector.broadcast %cst_78 : f32 to vector<2x32xf32>
    %240 = arith.addf %239, %238 : vector<2x32xf32>
    %241 = arith.divf %239, %240 : vector<2x32xf32>
    %242 = vector.extract_strided_slice %229 {offsets = [0, 64], sizes = [2, 32], strides = [1, 1]} : vector<2x128xf32> to vector<2x32xf32>
    %243 = math.tanh %242 : vector<2x32xf32>
    %244 = vector.extract_strided_slice %229 {offsets = [0, 96], sizes = [2, 32], strides = [1, 1]} : vector<2x128xf32> to vector<2x32xf32>
    %245 = arith.negf %244 : vector<2x32xf32>
    %246 = math.exp %245 : vector<2x32xf32>
    %cst_79 = arith.constant 1.000000e+00 : f32
    %247 = vector.broadcast %cst_79 : f32 to vector<2x32xf32>
    %248 = arith.addf %247, %246 : vector<2x32xf32>
    %249 = arith.divf %247, %248 : vector<2x32xf32>
    %250 = arith.mulf %241, %222 : vector<2x32xf32>
    %251 = arith.mulf %235, %243 : vector<2x32xf32>
    %252 = arith.addf %250, %251 : vector<2x32xf32>
    %253 = math.tanh %252 : vector<2x32xf32>
    %254 = arith.mulf %249, %253 : vector<2x32xf32>
    %c0_80 = arith.constant 0 : index
    %c6_81 = arith.constant 6 : index
    %c0_82 = arith.constant 0 : index
    %255 = vector.load %arg8[%c0_80, %c6_81, %c0_82] : memref<2x8x32xf32, #tpu.memory_space<vmem>>, vector<2x1x32xf32>
    %256 = vector.shape_cast %255 : vector<2x1x32xf32> to vector<2x32xf32>
    %257 = vector.shape_cast %254 : vector<2x32xf32> to vector<2x1x32xf32>
    tpu.vector_store %arg8[%c0_80, %c6_81, %c0_82], %257 {strides = array<i32>} : memref<2x8x32xf32, #tpu.memory_space<vmem>>, vector<2x1x32xf32>,
    %cst_83 = arith.constant dense<0.000000e+00> : vector<2x128xf32>
    %258 = tpu.matmul %254, %6, %cst_83 {dimension_numbers = #tpu.dot_dimension_numbers<[1], [0], [0], [1], [0, 0, 1, 1], [], []>} : vector<2x32xf32>, vector<32x128xf32>, vector<2x128xf32> -> vector<2x128xf32>
    %259 = arith.addf %47, %258 : vector<2x128xf32>
    %260 = vector.extract_strided_slice %259 {offsets = [0, 0], sizes = [2, 32], strides = [1, 1]} : vector<2x128xf32> to vector<2x32xf32>
    %261 = arith.negf %260 : vector<2x32xf32>
    %262 = math.exp %261 : vector<2x32xf32>
    %cst_84 = arith.constant 1.000000e+00 : f32
    %263 = vector.broadcast %cst_84 : f32 to vector<2x32xf32>
    %264 = arith.addf %263, %262 : vector<2x32xf32>
    %265 = arith.divf %263, %264 : vector<2x32xf32>
    %266 = vector.extract_strided_slice %259 {offsets = [0, 32], sizes = [2, 32], strides = [1, 1]} : vector<2x128xf32> to vector<2x32xf32>
    %267 = arith.negf %266 : vector<2x32xf32>
    %268 = math.exp %267 : vector<2x32xf32>
    %cst_85 = arith.constant 1.000000e+00 : f32
    %269 = vector.broadcast %cst_85 : f32 to vector<2x32xf32>
    %270 = arith.addf %269, %268 : vector<2x32xf32>
    %271 = arith.divf %269, %270 : vector<2x32xf32>
    %272 = vector.extract_strided_slice %259 {offsets = [0, 64], sizes = [2, 32], strides = [1, 1]} : vector<2x128xf32> to vector<2x32xf32>
    %273 = math.tanh %272 : vector<2x32xf32>
    %274 = vector.extract_strided_slice %259 {offsets = [0, 96], sizes = [2, 32], strides = [1, 1]} : vector<2x128xf32> to vector<2x32xf32>
    %275 = arith.negf %274 : vector<2x32xf32>
    %276 = math.exp %275 : vector<2x32xf32>
    %cst_86 = arith.constant 1.000000e+00 : f32
    %277 = vector.broadcast %cst_86 : f32 to vector<2x32xf32>
    %278 = arith.addf %277, %276 : vector<2x32xf32>
    %279 = arith.divf %277, %278 : vector<2x32xf32>
    %280 = arith.mulf %271, %252 : vector<2x32xf32>
    %281 = arith.mulf %265, %273 : vector<2x32xf32>
    %282 = arith.addf %280, %281 : vector<2x32xf32>
    %283 = math.tanh %282 : vector<2x32xf32>
    %284 = arith.mulf %279, %283 : vector<2x32xf32>
    %c0_87 = arith.constant 0 : index
    %c7_88 = arith.constant 7 : index
    %c0_89 = arith.constant 0 : index
    %285 = vector.load %arg8[%c0_87, %c7_88, %c0_89] : memref<2x8x32xf32, #tpu.memory_space<vmem>>, vector<2x1x32xf32>
    %286 = vector.shape_cast %285 : vector<2x1x32xf32> to vector<2x32xf32>
    %287 = vector.shape_cast %284 : vector<2x32xf32> to vector<2x1x32xf32>
    tpu.vector_store %arg8[%c0_87, %c7_88, %c0_89], %287 {strides = array<i32>} : memref<2x8x32xf32, #tpu.memory_space<vmem>>, vector<2x1x32xf32>,
    %c0_90 = arith.constant 0 : index
    %c0_91 = arith.constant 0 : index
    %288 = vector.load %arg11[%c0_90, %c0_91] : memref<2x32xf32, #tpu.memory_space<vmem>>, vector<2x32xf32>
    tpu.vector_store %arg11[%c0_90, %c0_91], %284 {strides = array<i32>} : memref<2x32xf32, #tpu.memory_space<vmem>>, vector<2x32xf32>,
    %c0_92 = arith.constant 0 : index
    %c0_93 = arith.constant 0 : index
    %289 = vector.load %arg12[%c0_92, %c0_93] : memref<2x32xf32, #tpu.memory_space<vmem>>, vector<2x32xf32>
    tpu.vector_store %arg12[%c0_92, %c0_93], %282 {strides = array<i32>} : memref<2x32xf32, #tpu.memory_space<vmem>>, vector<2x32xf32>,
    %c1_i32 = arith.constant 1 : i32
    %290 = arith.cmpi eq, %arg1, %c1_i32 : i32
    %291 = arith.extui %290 : i1 to i32
    %c0_i32_94 = arith.constant 0 : i32
    %292 = arith.cmpi ne, %291, %c0_i32_94 : i32
    scf.if %292 {
      %c0_95 = arith.constant 0 : index
      %c0_96 = arith.constant 0 : index
      %293 = vector.load %arg9[%c0_95, %c0_96] : memref<2x32xf32, #tpu.memory_space<vmem>>, vector<2x32xf32>
      tpu.vector_store %arg9[%c0_95, %c0_96], %284 {strides = array<i32>} : memref<2x32xf32, #tpu.memory_space<vmem>>, vector<2x32xf32>,
      %c0_97 = arith.constant 0 : index
      %c0_98 = arith.constant 0 : index
      %294 = vector.load %arg10[%c0_97, %c0_98] : memref<2x32xf32, #tpu.memory_space<vmem>>, vector<2x32xf32>
      tpu.vector_store %arg10[%c0_97, %c0_98], %282 {strides = array<i32>} : memref<2x32xf32, #tpu.memory_space<vmem>>, vector<2x32xf32>,
    } else {
    }
    return
  }
  func.func @transform_0(%arg0: i32, %arg1: i32) -> (i32, i32, i32) {
    %c0_i32 = arith.constant 0 : i32
    %c0_i32_0 = arith.constant 0 : i32
    return %arg0, %arg1, %c0_i32 : i32, i32, i32
  }
  func.func @transform_1(%arg0: i32, %arg1: i32) -> (i32, i32) {
    %c0_i32 = arith.constant 0 : i32
    %c0_i32_0 = arith.constant 0 : i32
    return %arg0, %c0_i32 : i32, i32
  }
  func.func @transform_2(%arg0: i32, %arg1: i32) -> (i32, i32) {
    %c0_i32 = arith.constant 0 : i32
    %c0_i32_0 = arith.constant 0 : i32
    return %arg0, %c0_i32 : i32, i32
  }
  func.func @transform_3(%arg0: i32, %arg1: i32) -> (i32, i32) {
    %c0_i32 = arith.constant 0 : i32
    %c0_i32_0 = arith.constant 0 : i32
    %c0_i32_1 = arith.constant 0 : i32
    return %c0_i32, %c0_i32_0 : i32, i32
  }
  func.func @transform_4(%arg0: i32, %arg1: i32) -> (i32, i32) {
    %c0_i32 = arith.constant 0 : i32
    %c0_i32_0 = arith.constant 0 : i32
    %c0_i32_1 = arith.constant 0 : i32
    return %c0_i32, %c0_i32_0 : i32, i32
  }
  func.func @transform_5(%arg0: i32, %arg1: i32) -> (i32, i32) {
    %c0_i32 = arith.constant 0 : i32
    %c0_i32_0 = arith.constant 0 : i32
    %c0_i32_1 = arith.constant 0 : i32
    return %c0_i32, %c0_i32_0 : i32, i32
  }
  func.func @transform_6(%arg0: i32, %arg1: i32) -> (i32, i32, i32) {
    %c0_i32 = arith.constant 0 : i32
    %c0_i32_0 = arith.constant 0 : i32
    return %arg0, %arg1, %c0_i32 : i32, i32, i32
  }
  func.func @transform_7(%arg0: i32, %arg1: i32) -> (i32, i32) {
    %c0_i32 = arith.constant 0 : i32
    %c0_i32_0 = arith.constant 0 : i32
    return %arg0, %c0_i32 : i32, i32
  }
  func.func @transform_8(%arg0: i32, %arg1: i32) -> (i32, i32) {
    %c0_i32 = arith.constant 0 : i32
    %c0_i32_0 = arith.constant 0 : i32
    return %arg0, %c0_i32 : i32, i32
  }
}

</mosaic_0001>

<bundles_post_ra>
// kernel: tpu_custom_call.1
= control target key start
LH: loop header
LB: loop body
LE: loop exit
PB: predicated region body
PF: predicated region fallthrough
CT: control target
= control target key end

     0   :  { %s3756_s0 = inlined_call_operand.hbm [shape: f32[2,16,16], index: 0, kind: input, shape index: {}]   ;;  %s3757_s1 = inlined_call_operand.hbm [shape: f32[2,32], index: 1, kind: input, shape index: {}]   ;;  %s3758_s2 = inlined_call_operand.vmem [shape: f32[2,32], index: 2, kind: input, shape index: {}]   ;;  %s3759_s3 = inlined_call_operand.hbm [shape: f32[16,128], index: 3, kind: input, shape index: {}]   ;;  %s3760_s4 = inlined_call_operand.hbm [shape: f32[32,128], index: 4, kind: input, shape index: {}]   ;;  %s3761_s5 = inlined_call_operand.vmem [shape: f32[1,128], index: 5, kind: input, shape index: {}]   ;;  %s3762_s6 = inlined_call_operand.hbm [shape: f32[2,16,32], index: 6, kind: output, shape index: {0}]   ;;  %s3763_s7 = inlined_call_operand.hbm [shape: f32[2,32], index: 7, kind: output, shape index: {1}]   ;;  %s3764_s8 = inlined_call_operand.hbm [shape: f32[2,32], index: 8, kind: output, shape index: {2}]  }
   0x1   :  { %3779 = sst [smem:[#allocation25_spill]] %s3757_s1 }
   0x2   :  { %3780 = sst [smem:[#allocation26_spill]] %s3759_s3 }
   0x3   :  { %3781 = sst [smem:[#allocation27_spill]] %s3760_s4 }
   0x4   :  { %3782 = sst [smem:[#allocation28_spill]] %s3764_s8 }
   0x5   :  { %14 = vsyncpa [#allocation5], 0 }
   0x6   :  { %16 = vsyncpa [#allocation5 + $0x1], 0 }
   0x7   :  { %17 = vsyncpa [#allocation8], 0 }
   0x8   :  { %18 = vsyncpa [#allocation11], 0 }
   0x9   :  { %19 = vsyncpa [#allocation6], 0 }
   0xa   :  { %21 = vsyncpa [#allocation6 + $0x1], 0 }
   0xb   :  { %22 = vsyncpa [#allocation14], 0  ;;  %s3143_s27 = smov 0   ;;  %s3145_s28 = smov 0  }
   0xc   :  { %s3147_s29 = smov 0   ;;  %s3149_s30 = smov 0  }
   0xd   :  { %s3151_s9 = smov 0   ;;  %s3153_s10 = smov 0  }
   0xe LB: > { %3783 = sst [smem:[#allocation21_spill]] %s3057_s27  ;;  %s2389_s11 = sadd.s32 4294967295, %s3077_s10   ;;  %s3077_s10 = sphi %s3153_s10, %s28_s10   ;;  %s3073_s9 = sphi %s3151_s9, %s3817_s9   ;;  %s3069_s30 = sphi %s3149_s30, %s3816_s30   ;;  %s3065_s29 = sphi %s3147_s29, %s3815_s29   ;;  %s3061_s28 = sphi %s3145_s28, %s3814_s28   ;;  %s3057_s27 = sphi %s3143_s27, %s3813_s27  }
   0xf   : > { %3784 = sst [smem:[#allocation22_spill]] %s3077_s10  ;;  %s2390_s12 = sadd.s32 4294967294, %s3077_s10  }
  0x10   : > { %p56_p0 = scmp.ne.s32.totalorder %s3065_s29, %s3061_s28  ;;  %p57_p1 = scmp.eq.s32.totalorder %s3077_s10, 0 }
  0x11   : > { %p62_p2 = scmp.ne.s32.totalorder %s3061_s28, %s3057_s27  ;;  %p3180_p3 = scmp.eq.s32.totalorder %s2389_s11, 0 }
  0x12   : > { %p3184_p4 = por %p57_p1, %p56_p0  ;;  %p3188_p5 = scmp.eq.s32.totalorder %s2389_s11, 1 }
  0x13   : > { %s3785_s13 = scalar_select %p3180_p3, 1, 0 }
  0x14   : > { %s3787_s15 = scalar_select %p3188_p5, 1, 0 }
  0x15   : > { %p3194_p6 = por %p3180_p3, %p62_p2  ;;  %p209_p7 = scmp.eq.s32.totalorder %s2390_s12, 1 }
  0x16   : > { %p3200_p8 = por %p3188_p5, %p56_p0  ;;  %p2391_p9 = scmp.ge.s32.totalorder %s3077_s10, 1 }
  0x17   : > { %s3788_s16 = scalar_select %p3194_p6, 1, 0 }
  0x18   : > { %s3789_s17 = scalar_select %p3200_p8, 1, 0 }
  0x19   : > { %p3205_p10 = por %p209_p7, %p62_p2  ;;  %p268_p11 = scmp.lt.s32.totalorder %s3077_s10, 3 }
  0x1a   : > { %s3079_s20 = smov [#allocation7]   ;;  %p2693_p1 = scmp.lt.s32.totalorder %s3077_s10, 2 }
  0x1b   : > { %s3790_s18 = scalar_select %p3205_p10, 1, 0 }
  0x1c   : > { %p3210_p12 = pnand %p2391_p9, %p268_p11  ;;  %s283_s21 = sshll.u32 %s3079_s20, 4  ;;  %s284_s21 = int_to_ptr.vmem [resolvable:$true] %s283_s21 }
  0x1d   : > { %3791 = sst [smem:[#allocation23_spill]] %s3790_s18  ;;  %p3226_p2 = pnand %p2693_p1, %p3184_p4 }
  0x1e   : > { %s3792_s19 = scalar_select %p3210_p12, 1, 0 }
  0x1f   : > { %p2672_p0 = pneg %p3210_p12  ;;  %s3080_s24 = smov [#allocation9]  }
  0x20   : > { %s300_s25 = sshll.u32 %s3080_s24, 4  ;;  %s2842_s26 = scalar_lea.vmem %s284_s21, 32  ;;  %s301_s25 = int_to_ptr.vmem [resolvable:$true] %s300_s25 }
  0x21   : > { %p3220_p8 = pnand %p2672_p0, %p3180_p3  ;;  %p2843_p9 = scmp.ne.s32.totalorder %s284_s21, %s2842_s26 }
  0x22   : > { %p2850_p13 = scmp.lt.s32.totalorder %s284_s21, %s284_s21  ;;  %p2851_p10 = scmp.lt.s32.totalorder %s2842_s26, %s2842_s26 }
  0x23   : > { %p2833_p7 = pneg %p3220_p8 }
  0x24   : > { %p2852_p5 = por %p2851_p10, %p2850_p13 }
  0x25   : > { %p2845_p11 = pnand %p2843_p9, %p2833_p7 }
  0x27   : > { %p2846_p0 = pneg %p2845_p11 }
  0x29   : > { %p2853_p3 = pnand %p2852_p5, %p2846_p0 }
  0x2b   : > { %2856 = shalt.err (!%p2853_p3)
}
  0x2c   : > { %s3795_s1 = sld [smem:[#allocation25_spill]]  ;;  %s2868_s14 = scalar_lea.vmem %s301_s25, 256 }
  0x2d   : > { %p2869_p4 = scmp.ne.s32.totalorder %s301_s25, %s2868_s14  ;;  %p2876_p11 = scmp.lt.s32.totalorder %s301_s25, %s301_s25 }
  0x2e   : > { %p2877_p6 = scmp.lt.s32.totalorder %s2868_s14, %s2868_s14 }
  0x2f   : > { %p2871_p1 = pnand %p2869_p4, %p2833_p7 }
  0x30   : > { %p2878_p12 = por %p2877_p6, %p2876_p11 }
  0x31   : > { %p2872_p9 = pneg %p2871_p1 }
  0x32   : > { %2675 = dma.hbm_to_vmem [thread:$0]  (!%p3220_p8), %s3795_s1, 32, %s284_s21, [#allocation8]  }
  0x33   : > { %p2879_p10 = pnand %p2878_p12, %p2872_p9 }
  0x35   : > { %2882 = shalt.err (!%p2879_p10)
}
  0x36   : > { %s3776_s20 = smov 128   ;;  %s3777_s24 = smov 8  }
  0x37   : > { %s3796_s3 = sld [smem:[#allocation26_spill]]  ;;  %s3083_s11 = smov [#allocation10]  }
  0x38   : > { %s313_s12 = sshll.u32 %s3083_s11, 4  ;;  %s314_s12 = int_to_ptr.vmem [resolvable:$true] %s313_s12 }
  0x39   : > { %s2894_s1 = scalar_lea.vmem %s314_s12, 512  ;;  %p2902_p12 = scmp.lt.s32.totalorder %s314_s12, %s314_s12 }
  0x3a   : > { %p2895_p3 = scmp.ne.s32.totalorder %s314_s12, %s2894_s1  ;;  %p2903_p13 = scmp.lt.s32.totalorder %s2894_s1, %s2894_s1 }
  0x3c   : > { %p2897_p5 = pnand %p2895_p3, %p2833_p7  ;;  %p2904_p0 = por %p2903_p13, %p2902_p12 }
  0x3d   : > { %2678 = dma.hbm_to_vmem [thread:$0]  (!%p3220_p8), %s3796_s3, 256, %s301_s25, [#allocation8], %s3776_s20, %s3776_s20, %s3777_s24  }
  0x3e   : > { %p2898_p6 = pneg %p2897_p5 }
  0x40   : > { %p2905_p4 = pnand %p2904_p0, %p2898_p6 }
  0x42   : > { %2908 = shalt.err (!%p2905_p4)
}
  0x43   : > { %s3797_s4 = sld [smem:[#allocation27_spill]]  ;;  %s37_s1 = sadd.s32 1, %s3073_s9 }
  0x44   : > { %s49_s21 = sadd.s32 1, %s3065_s29  ;;  %p38_p7 = scmp.ge.s32.totalorder %s37_s1, 2 }
  0x45   : > { %s330_s26 = sand.u32 1, %s3065_s29   ;;  %s2398_s22 = sshll.u32 %s3073_s9, 7 }
  0x46   : > { %s2397_s11 = sshll.u32 %s330_s26, 4  ;;  %s3819_s1 = smov (%p38_p7, %s37_s1), 0 }
  0x47   : > { %3798 = sst [smem:[#allocation24_spill]] %s3819_s1  ;;  %s45_s3 = ssub.s32 %s3073_s9, %s3819_s1 }
  0x48   : > { %s342_s14 = scalar_lea.hbm %s3756_s0, %s2398_s22  ;;  %p47_p1 = scmp.eq.s32.totalorder %s45_s3, 0 }
  0x49   : > { %2681 = dma.hbm_to_vmem [thread:$0]  (!%p3220_p8), %s3797_s4, 512, %s314_s12, [#allocation11], %s3776_s20, %s3776_s20, %s3777_s24  }
  0x4a   : > { %s334_s18 = scalar_lea.vmem [#allocation4], %s2397_s11  ;;  %s331_s20 = scalar_lea.sflag [#allocation5], %s330_s26 }
  0x4b   : > { %s343_s27 = sshll.u32 %s334_s18, 4  ;;  %p2911_p8 = pneg %p3226_p2  ;;  %s344_s27 = int_to_ptr.vmem [resolvable:$true] %s343_s27 }
  0x4c   : > { %s3274_s12 = scalar_select %p47_p1, %s3065_s29, %s49_s21  }
  0x4d   : > { %s2922_s24 = scalar_lea.vmem %s344_s27, 256  ;;  %s3084_s4 = smov [#allocation4]  }
  0x4e   : > { %p2923_p9 = scmp.ne.s32.totalorder %s344_s27, %s2922_s24  ;;  %s2927_s8 = sshll.u32 %s3084_s4, 4  ;;  %s2928_s8 = int_to_ptr.vmem [resolvable:$false] %s2927_s8 }
  0x4f   : > { %s2929_s1 = scalar_lea.vmem %s2928_s8, 512  ;;  %p2930_p3 = scmp.lt.s32.totalorder %s344_s27, %s2928_s8 }
  0x50   : > { %p2925_p11 = pnand %p2923_p9, %p2911_p8  ;;  %p2931_p5 = scmp.lt.s32.totalorder %s2929_s1, %s2922_s24 }
  0x52   : > { %p2926_p10 = pneg %p2925_p11  ;;  %p2932_p6 = por %p2931_p5, %p2930_p3 }
  0x54   : > { %p2933_p12 = pnand %p2932_p6, %p2926_p10 }
  0x56   : > { %2936 = shalt.err (!%p2933_p12)
}
  0x57   : > { %s3085_s3 = smov 256   ;;  %s3799_s10 = smov 8  }
  0x58   : > { %s3800_s18 = smov 128   ;;  %p3801_p13 = scmp.ne.s32.totalorder %s3792_s19, 0 }
  0x59   : > { %2685 = dma.hbm_to_vmem [thread:$0]  (!%p3226_p2), %s342_s14, 256, %s344_s27, %s331_s20, %s3085_s3, %s3800_s18, %s3799_s10  }
  0x5a   : > { %355 = sbr.rel (%p3801_p13) target bundleno = 5720 (0x1658), region = 44  ;;  %s3285_s21 = sand.u32 (!%p3801_p13), 1, %s3061_s28  }
  0x5b   : > { %s2400_s4 = sshll.u32 (!%p3801_p13), %s3285_s21, 4  ;;  %s358_s8 = scalar_lea.sflag (!%p3801_p13), [#allocation5], %s3285_s21 }
  0x5c   : > { %s3289_s24 = scalar_lea.vmem (!%p3801_p13), [#allocation4], %s2400_s4  ;;  %p3802_p0 = scmp.ne.s32.totalorder (!%p3801_p13), %s3788_s16, 0 }
  0x5f   : > { %3036 = dma.done.wait (%p3802_p0), %s358_s8, 256  }
  0x60   : > { %3038 = vsyncadd (%p3802_p0), %s358_s8, 4294967040  ;;  %p3803_p2 = scmp.ne.s32.totalorder %s3785_s13, 0 }
  0x62   : > { %3040 = dma.done.wait (%p3803_p2), [#allocation8], 288  }
  0x63   : > { %3042 = vsyncadd (%p3803_p2), [#allocation8], 4294967008 }
  0x64   : > { %3044 = dma.done.wait (%p3803_p2), [#allocation11], 512  }
  0x65   : > { %3046 = vsyncadd (%p3803_p2), [#allocation11], 4294966784  ;;  %s3303_s27 = scalar_lea.vmem [#allocation12], %s2400_s4  ;;  %p2405_p4 = scmp.ne.s32.totalorder %s3069_s30, 0 }
  0x67   : > { %419 = sbr.rel (%p2405_p4) target bundleno = 110 (0x6e), region = 64 }
  0x6c   : > { %v420_v0 = vld [vmem:[#allocation7] sm:$0x3]  ;;  %vm421_vm0 = vcmask 254976   ;;  %v423_v1 = vld [vmem:[%s3758_s2] sm:$0x3] }
  0x6d   : > { %422 = vst.msk [vmem:[#allocation2] sm:$0x3] %vm421_vm0, %v420_v0  ;;  %424 = vst.msk [vmem:[#allocation3] sm:$0x3] %vm421_vm0, %v423_v1 }
  0x6e PF: > { %v3309_v2 = vld [vmem:[#allocation9 + $0x8] sm:$0xff]  ;;  %v3086_v3 = vmov 0.0   ;;  %v3312_v4 = vld [vmem:[#allocation9] sm:$0xff]  ;;  %vm3087_vm1 = vmmov 0   ;;  %vm445_vm2 = vcmask 1041409   ;;  %vm447_vm3 = vcmask 130048  }
  0x6f   : > { %2504 = vmatprep.subr.mxu0 %v3086_v3  ;;  %2508 = vmatprep.mubr.msk.f32.mxu0 %vm3087_vm1, %v3086_v3  ;;  %v434_v5 = vld [vmem:[%s3289_s24] sm:$0x1]  ;;  %v435_v6 = vld [vmem:[%s3289_s24 + $0x8] sm:$0x1]  ;;  %v599_v8 = vld [vmem:[%s3289_s24 + $0xa] sm:$0x1] }
  0x70   : > { %2505 = vmatpush3.msra.mxu0 %v3309_v2  ;;  %v444_v7 = vrot.slane %v435_v6, 7  ;;  %2511 = vmatprep.subr.mxu1 %v3086_v3  ;;  %v598_v9 = vld [vmem:[%s3289_s24 + $0x2] sm:$0x1]  ;;  %v602_v10 = vrot.slane %v599_v8, 7  ;;  %v755_v11 = vld [vmem:[%s3289_s24 + $0xc] sm:$0x1] }
  0x71   : > { %2506 = vmatprep.subr.mxu0 %v3086_v3  ;;  %2512 = vmatpush3.msra.mxu1 %v3309_v2  ;;  %v758_v14 = vrot.slane %v755_v11, 7  ;;  %v754_v15 = vld [vmem:[%s3289_s24 + $0x4] sm:$0x1]  ;;  %v911_v16 = vld [vmem:[%s3289_s24 + $0xe] sm:$0x1]  ;;  %vm1066_vm4 = vcmask 261120  }
  0x72   : > { %2507 = vmatpush3.msra.mxu0 %v3312_v4  ;;  %v446_v12 = vsel %vm445_vm2, %v444_v7, %v434_v5  ;;  %2513 = vmatprep.subr.mxu1 %v3086_v3  ;;  %v603_v13 = vsel %vm445_vm2, %v602_v10, %v598_v9  ;;  %v914_v18 = vrot.slane %v911_v16, 7  ;;  %v910_v19 = vld [vmem:[%s3289_s24 + $0x6] sm:$0x1]  ;;  %v3358_v21 = vld [vmem:[#allocation10 + $0x18] sm:$0xff]  ;;  %v3369_v23 = vld [vmem:[#allocation10 + $0x8] sm:$0xff]  ;;  %s3088_s20 = smov 64  }
  0x73   : > { %2509 = vmatmul.mubr.msk.f32.vlgmr.msra.gmra.mxu0 %vm447_vm3, %v446_v12  ;;  %2518 = vmatprep.subr.mxu0 %v3086_v3  ;;  %v759_v17 = vsel %vm445_vm2, %v758_v14, %v754_v15  ;;  %v3363_v22 = vld [vmem:[#allocation10 + $0x10] sm:$0xff]  ;;  %v3373_v24 = vld [vmem:[#allocation10] sm:$0xff]  ;;  %v3399_v34 = vld [vmem:[%s3761_s5] ss:$0 sm:$0xff]  ;;  %s3089_s1 = smov 32   ;;  %vm1206_vm5 = vcmask 253952  }
  0x74   : > { %2519 = vmatpush3.msra.mxu0 %v3309_v2  ;;  %2522 = vmatprep.mubr.msk.f32.mxu0 %vm3087_vm1, %v3086_v3  ;;  %v915_v20 = vsel %vm445_vm2, %v914_v18, %v910_v19  ;;  %v425_v25 = vld [vmem:[#allocation2] sm:$0x3]  ;;  %v426_v40 = vld [vmem:[#allocation3] sm:$0x3]  ;;  %v520_v51 = vld [vmem:[%s3289_s24 + $0x1] sm:$0x1] }
  0x75   : > { %2520 = vmatprep.subr.mxu0 %v3086_v3  ;;  %2514 = vmatpush3.msra.mxu1 %v3312_v4  ;;  %v521_v52 = vld [vmem:[%s3289_s24 + $0x9] sm:$0x1]  ;;  %v677_v54 = vld [vmem:[%s3289_s24 + $0xb] sm:$0x1]  ;;  %v676_v55 = vld [vmem:[%s3289_s24 + $0x3] sm:$0x1] }
  0x76   : > { %2521 = vmatpush3.msra.mxu0 %v3312_v4  ;;  %2515 = vmatprep.mubr.msk.f32.mxu1 %vm3087_vm1, %v3086_v3  ;;  %v524_v53 = vrot.slane %v521_v52, 7  ;;  %v680_v56 = vrot.slane %v677_v54, 7  ;;  %v833_v57 = vld [vmem:[%s3289_s24 + $0xd] sm:$0x1]  ;;  %v832_v61 = vld [vmem:[%s3289_s24 + $0x5] sm:$0x1] }
  0x77   : > { %2523 = vmatmul.mubr.msk.f32.vlgmr.msra.gmra.mxu0 %vm447_vm3, %v603_v13  ;;  %2532 = vmatprep.subr.mxu0 %v3086_v3  ;;  %v836_v60 = vrot.slane %v833_v57, 7  ;;  %v989_v62 = vld [vmem:[%s3289_s24 + $0xf] sm:$0x1]  ;;  %v988_v5 = vld [vmem:[%s3289_s24 + $0x7] sm:$0x1]  ;;  %s3091_s26 = smov 96  }
  0x78   : > { %2533 = vmatpush3.msra.mxu0 %v3309_v2  ;;  %2536 = vmatprep.mubr.msk.f32.mxu0 %vm3087_vm1, %v3086_v3  ;;  %v525_v58 = vsel %vm445_vm2, %v524_v53, %v520_v51  ;;  %v681_v59 = vsel %vm445_vm2, %v680_v56, %v676_v55  ;;  %v992_v1 = vrot.slane %v989_v62, 7  ;;  %vm2178_vm6 = vcmask 254976   ;;  %p2431_p7 = scmp.ne.s32.totalorder %s3069_s30, 1 }
  0x79   : > { %2534 = vmatprep.subr.mxu0 %v3086_v3  ;;  %2525 = vmatprep.subr.mxu1 %v3086_v3  ;;  %v837_v0 = vsel %vm445_vm2, %v836_v60, %v832_v61 }
  0x7a   : > { %2535 = vmatpush3.msra.mxu0 %v3312_v4  ;;  %2516 = vmatmul.mubr.msk.f32.vlgmr.msra.gmra.mxu1 %vm447_vm3, %v525_v58  ;;  %v993_v6 = vsel %vm445_vm2, %v992_v1, %v988_v5 }
  0x7b   : > { %2537 = vmatmul.mubr.msk.f32.vlgmr.msra.gmra.mxu0 %vm447_vm3, %v759_v17  ;;  %2546 = vmatprep.subr.mxu0 %v3086_v3 }
  0x7c   : > { %2547 = vmatpush3.msra.mxu0 %v3309_v2  ;;  %2550 = vmatprep.mubr.msk.f32.mxu0 %vm3087_vm1, %v3086_v3 }
  0x7d   : > { %2548 = vmatprep.subr.mxu0 %v3086_v3  ;;  %2526 = vmatpush3.msra.mxu1 %v3309_v2 }
  0x7e   : > { %2549 = vmatpush3.msra.mxu0 %v3312_v4  ;;  %2529 = vmatprep.mubr.msk.f32.mxu1 %vm3087_vm1, %v3086_v3 }
  0x7f   : > { %2551 = vmatmul.mubr.msk.f32.vlgmr.msra.gmra.mxu0 %vm447_vm3, %v915_v20  ;;  %2560 = vmatprep.subr.mxu0 %v3086_v3 }
  0x80   : > { %2561 = vmatpush3.msra.mxu0 %v3358_v21  ;;  %2568 = vmatprep.mubr.msk.f32.mxu0 %vm3087_vm1, %v3086_v3 }
  0x81   : > { %2562 = vmatprep.subr.mxu0 %v3086_v3  ;;  %2527 = vmatprep.subr.mxu1 %v3086_v3 }
  0x82   : > { %2563 = vmatpush3.msra.mxu0 %v3363_v22  ;;  %2528 = vmatpush3.msra.mxu1 %v3312_v4 }
  0x83   : > { %2564 = vmatprep.subr.mxu0 %v3086_v3  ;;  %2530 = vmatmul.mubr.msk.f32.vlgmr.msra.gmra.mxu1 %vm447_vm3, %v681_v59 }
  0x84   : > { %2565 = vmatpush3.msra.mxu0 %v3369_v23  ;;  %2539 = vmatprep.subr.mxu1 %v3086_v3 }
  0x85   : > { %2566 = vmatprep.subr.mxu0 %v3086_v3  ;;  %2540 = vmatpush3.msra.mxu1 %v3309_v2 }
  0x86   : > { %2567 = vmatpush3.msra.mxu0 %v3373_v24  ;;  %2541 = vmatprep.subr.mxu1 %v3086_v3 }
  0x87   : > { %2569 = vmatmul.mubr.msk.f32.vlgmr.msra.gmra.mxu0 %vm1066_vm4, %v425_v25  ;;  %2582 = vmatprep.subr.mxu0 %v3086_v3 }
  0x88   : > { %2583 = vmatpush3.msra.mxu0 %v3358_v21  ;;  %2590 = vmatprep.mubr.msk.f32.mxu0 %vm3087_vm1, %v3086_v3 }
  0x89   : > { %2584 = vmatprep.subr.mxu0 %v3086_v3  ;;  %2543 = vmatprep.mubr.msk.f32.mxu1 %vm3087_vm1, %v3086_v3 }
  0x8a   : > { %2585 = vmatpush3.msra.mxu0 %v3363_v22  ;;  %2542 = vmatpush3.msra.mxu1 %v3312_v4 }
  0x8b   : > { %2586 = vmatprep.subr.mxu0 %v3086_v3  ;;  %2544 = vmatmul.mubr.msk.f32.vlgmr.msra.gmra.mxu1 %vm447_vm3, %v837_v0 }
  0x8c   : > { %2587 = vmatpush3.msra.mxu0 %v3369_v23  ;;  %2553 = vmatprep.subr.mxu1 %v3086_v3 }
  0x8d   : > { %2588 = vmatprep.subr.mxu0 %v3086_v3  ;;  %2554 = vmatpush3.msra.mxu1 %v3309_v2 }
  0x8e   : > { %2589 = vmatpush3.msra.mxu0 %v3373_v24  ;;  %2557 = vmatprep.mubr.msk.f32.mxu1 %vm3087_vm1, %v3086_v3 }
  0x8f   : > { %2604 = vmatprep.subr.mxu0 %v3086_v3  ;;  %2555 = vmatprep.subr.mxu1 %v3086_v3 }
  0x90   : > { %2556 = vmatpush3.msra.mxu1 %v3312_v4 }
  0x91   : > { %2558 = vmatmul.mubr.msk.f32.vlgmr.msra.gmra.mxu1 %vm447_vm3, %v993_v6  ;;  %2571 = vmatprep.subr.mxu1 %v3086_v3 }
  0x92   : > { %2572 = vmatpush3.msra.mxu1 %v3358_v21  ;;  %2579 = vmatprep.mubr.msk.f32.mxu1 %vm3087_vm1, %v3086_v3 }
  0x93   : > { %2573 = vmatprep.subr.mxu1 %v3086_v3 }
  0x94   : > { %2574 = vmatpush3.msra.mxu1 %v3363_v22 }
  0x95   : > { %2575 = vmatprep.subr.mxu1 %v3086_v3 }
  0x96   : > { %2576 = vmatpush3.msra.mxu1 %v3369_v23 }
  0x97   : > { %2577 = vmatprep.subr.mxu1 %v3086_v3 }
  0x98   : > { %2578 = vmatpush3.msra.mxu1 %v3373_v24 }
  0x99   : > { %2593 = vmatprep.subr.mxu1 %v3086_v3 }
 0x133   : > { %v516_v26 = vpop.f32.mrf.mxu0 }
 0x134   : > { %v517_v35 = vadd.f32 %v3399_v34, %v516_v26 }
 0x135   : > { %v2510_v27 = vpop.f32.mrf.mxu0 }
 0x137   : > { %v3390_v28 = vpop.f32.mrf.mxu0 }
 0x139   : > { %v2524_v29 = vpop.f32.mrf.mxu0 }
 0x13a   : > { %v594_v7 = vpop.f32.mrf.mxu1 }
 0x13b   : > { %v3392_v30 = vpop.f32.mrf.mxu0  ;;  %v595_v16 = vadd.f32 %v3399_v34, %v594_v7 }
 0x13c   : > { %v2517_v8 = vpop.f32.mrf.mxu1 }
 0x13d   : > { %v2538_v31 = vpop.f32.mrf.mxu0 }
 0x13f   : > { %v3394_v32 = vpop.f32.mrf.mxu0 }
 0x141   : > { %v2552_v33 = vpop.f32.mrf.mxu0 }
 0x143   : > { %v3457_v9 = vpop.f32.mrf.mxu1 }
 0x144   : > { %v751_v59 = vadd.f32 %v3399_v34, %v3457_v9 }
 0x145   : > { %v2531_v10 = vpop.f32.mrf.mxu1 }
 0x147   : > { %v1136_v36 = vpop.f32.mrf.mxu0 }
 0x148   : > { %v1140_v37 = vadd.f32 %v1136_v36, %v517_v35 }
 0x149   : > { %v2570_v38 = vpop.f32.mrf.mxu0 }
 0x14a   : > { %2767 = vtanh.f32 %v1140_v37  ;;  %v2416_v41 = vmul.f32 -1.442695, %v1140_v37 }
 0x14b   : > { %v3459_v11 = vpop.f32.mrf.mxu1 }
 0x14c   : > { %2769 = vpow2.f32 %v2416_v41 }
 0x14d   : > { %v2545_v12 = vpop.f32.mrf.mxu1 }
 0x151   : > { %v3461_v13 = vpop.f32.mrf.mxu1 }
 0x153   : > { %v2559_v14 = vpop.f32.mrf.mxu1 }
 0x157   : > { %v2768_v39 = vpop.eup %2767 }
 0x158   : > { %1154 = vrot.lane.b32.xlu0 %v2768_v39, %s3088_s20 }
 0x159   : > { %v2770_v42 = vpop.eup %2769 }
 0x15a   : > { %v1144_v43 = vadd.f32 1.0, %v2770_v42  ;;  %v673_v42 = vadd.f32 %v3399_v34, %v3390_v28 }
 0x15c   : > { %1149 = vrot.lane.b32.xlu0 %v426_v40, %s3089_s1  ;;  %2771 = vrcp.f32 %v1144_v43 }
 0x169   : > { %v2772_v44 = vpop.eup %2771 }
 0x1ca   : > { %v1155_v45 = vpop.permute.xlu0 %1154 }
 0x1cb   : > { %v1157_v46 = vmul.f32 %v2772_v44, %v1155_v45 }
 0x1cd   : > { %1159 = vrot.lane.b32.xlu1 %v1157_v46, %s3089_s1 }
 0x1ce   : > { %v1150_v47 = vpop.permute.xlu0 %1149 }
 0x1cf   : > { %v1152_v48 = vmul.f32 %v2772_v44, %v1150_v47 }
 0x23f   : > { %v1160_v49 = vpop.permute.xlu1 %1159 }
 0x240   : > { %v3405_v50 = vadd.f32 %v1160_v49, %v1152_v48 }
 0x242   : > { %2773 = vtanh.f32 %v3405_v50 }
 0x24f   : > { %v2774_v63 = vpop.eup %2773 }
 0x250   : > { %1165 = vrot.lane.b32.xlu1 %v2774_v63, %s3088_s20 }
 0x2c2   : > { %v1166_v2 = vpop.permute.xlu1 %1165 }
 0x2c3   : > { %v3453_v4 = vmul.f32 %v2772_v44, %v1166_v2 }
 0x2c5   : > { %1209 = vrot.lane.b32.xlu0 %v3453_v4, %s3089_s1 }
 0x337   : > { %v1210_v15 = vpop.permute.xlu0 %1209 }
 0x338   : > { %2580 = vmatmul.mubr.msk.f32.vlgmr.msra.gmra.mxu1 %vm1066_vm4, %v1210_v15 }
 0x339   : > { %2594 = vmatpush3.msra.mxu1 %v3358_v21  ;;  %2601 = vmatprep.mubr.msk.f32.mxu1 %vm3087_vm1, %v3086_v3 }
 0x33a   : > { %2595 = vmatprep.subr.mxu1 %v3086_v3 }
 0x33b   : > { %2596 = vmatpush3.msra.mxu1 %v3363_v22 }
 0x33c   : > { %2597 = vmatprep.subr.mxu1 %v3086_v3 }
 0x33d   : > { %2598 = vmatpush3.msra.mxu1 %v3369_v23 }
 0x33e   : > { %2599 = vmatprep.subr.mxu1 %v3086_v3 }
 0x33f   : > { %2600 = vmatpush3.msra.mxu1 %v3373_v24 }
 0x340   : > { %2615 = vmatprep.subr.mxu1 %v3086_v3 }
 0x3f8   : > { %v1279_v17 = vpop.f32.mrf.mxu1 }
 0x3f9   : > { %v1283_v18 = vadd.f32 %v1279_v17, %v595_v16  ;;  %v829_v17 = vadd.f32 %v3399_v34, %v3392_v30 }
 0x3fa   : > { %v2581_v19 = vpop.f32.mrf.mxu1 }
 0x3fb   : > { %2775 = vtanh.f32 %v1283_v18  ;;  %v2418_v25 = vmul.f32 -1.442695, %v1283_v18 }
 0x3fd   : > { %2777 = vpow2.f32 %v2418_v25 }
 0x408   : > { %v2776_v20 = vpop.eup %2775 }
 0x409   : > { %1293 = vrot.lane.b32.xlu1 %v2776_v20, %s3088_s20 }
 0x40a   : > { %v2778_v26 = vpop.eup %2777 }
 0x40b   : > { %v1287_v27 = vadd.f32 1.0, %v2778_v26 }
 0x40d   : > { %2779 = vrcp.f32 %v1287_v27 }
 0x41a   : > { %v2780_v29 = vpop.eup %2779 }
 0x41b   : > { %v1291_v35 = vmul.f32 %v2780_v29, %v3405_v50 }
 0x47b   : > { %v1294_v31 = vpop.permute.xlu1 %1293 }
 0x47c   : > { %v1296_v33 = vmul.f32 %v2780_v29, %v1294_v31 }
 0x47e   : > { %1298 = vrot.lane.b32.xlu0 %v1296_v33, %s3089_s1 }
 0x4f0   : > { %v1299_v36 = vpop.permute.xlu0 %1298 }
 0x4f1   : > { %v1301_v37 = vadd.f32 %v1299_v36, %v1291_v35 }
 0x4f3   : > { %2781 = vtanh.f32 %v1301_v37 }
 0x500   : > { %v2782_v38 = vpop.eup %2781 }
 0x501   : > { %1304 = vrot.lane.b32.xlu1 %v2782_v38, %s3088_s20 }
 0x573   : > { %v1305_v39 = vpop.permute.xlu1 %1304 }
 0x574   : > { %v3479_v40 = vmul.f32 %v2780_v29, %v1305_v39 }
 0x576   : > { %1347 = vrot.lane.b32.xlu0 %v3479_v40, %s3089_s1 }
 0x5e8   : > { %v1348_v41 = vpop.permute.xlu0 %1347 }
 0x5e9   : > { %2591 = vmatmul.mubr.msk.f32.vlgmr.msra.gmra.mxu0 %vm1066_vm4, %v1348_v41 }
 0x5ea   : > { %2605 = vmatpush3.msra.mxu0 %v3358_v21  ;;  %2612 = vmatprep.mubr.msk.f32.mxu0 %vm3087_vm1, %v3086_v3 }
 0x5eb   : > { %2606 = vmatprep.subr.mxu0 %v3086_v3 }
 0x5ec   : > { %2607 = vmatpush3.msra.mxu0 %v3363_v22 }
 0x5ed   : > { %2608 = vmatprep.subr.mxu0 %v3086_v3 }
 0x5ee   : > { %2609 = vmatpush3.msra.mxu0 %v3369_v23 }
 0x5ef   : > { %2610 = vmatprep.subr.mxu0 %v3086_v3 }
 0x5f0   : > { %2611 = vmatpush3.msra.mxu0 %v3373_v24 }
 0x5f1   : > { %2626 = vmatprep.subr.mxu0 %v3086_v3 }
 0x6a9   : > { %v1417_v43 = vpop.f32.mrf.mxu0 }
 0x6aa   : > { %v1421_v44 = vadd.f32 %v1417_v43, %v673_v42  ;;  %v907_v43 = vadd.f32 %v3399_v34, %v3459_v11 }
 0x6ab   : > { %v2592_v45 = vpop.f32.mrf.mxu0 }
 0x6ac   : > { %2783 = vtanh.f32 %v1421_v44  ;;  %v2420_v47 = vmul.f32 -1.442695, %v1421_v44 }
 0x6ae   : > { %2785 = vpow2.f32 %v2420_v47 }
 0x6b9   : > { %v2784_v46 = vpop.eup %2783 }
 0x6ba   : > { %1431 = vrot.lane.b32.xlu1 %v2784_v46, %s3088_s20 }
 0x6bb   : > { %v2786_v48 = vpop.eup %2785 }
 0x6bc   : > { %v1425_v49 = vadd.f32 1.0, %v2786_v48 }
 0x6be   : > { %2787 = vrcp.f32 %v1425_v49 }
 0x6cb   : > { %v2788_v50 = vpop.eup %2787 }
 0x6cc   : > { %v1429_v53 = vmul.f32 %v2788_v50, %v1301_v37 }
 0x72c   : > { %v1432_v51 = vpop.permute.xlu1 %1431 }
 0x72d   : > { %v1434_v52 = vmul.f32 %v2788_v50, %v1432_v51 }
 0x72f   : > { %1436 = vrot.lane.b32.xlu0 %v1434_v52, %s3089_s1 }
 0x7a1   : > { %v1437_v54 = vpop.permute.xlu0 %1436 }
 0x7a2   : > { %v1439_v28 = vadd.f32 %v1437_v54, %v1429_v53 }
 0x7a4   : > { %2789 = vtanh.f32 %v1439_v28 }
 0x7b1   : > { %v2790_v55 = vpop.eup %2789 }
 0x7b2   : > { %1442 = vrot.lane.b32.xlu1 %v2790_v55, %s3088_s20 }
 0x824   : > { %v1443_v56 = vpop.permute.xlu1 %1442 }
 0x825   : > { %v3499_v57 = vmul.f32 %v2788_v50, %v1443_v56 }
 0x827   : > { %1485 = vrot.lane.b32.xlu0 %v3499_v57, %s3089_s1 }
 0x899   : > { %v1486_v58 = vpop.permute.xlu0 %1485 }
 0x89a   : > { %2602 = vmatmul.mubr.msk.f32.vlgmr.msra.gmra.mxu1 %vm1066_vm4, %v1486_v58 }
 0x89b   : > { %2616 = vmatpush3.msra.mxu1 %v3358_v21  ;;  %2623 = vmatprep.mubr.msk.f32.mxu1 %vm3087_vm1, %v3086_v3 }
 0x89c   : > { %2617 = vmatprep.subr.mxu1 %v3086_v3 }
 0x89d   : > { %2618 = vmatpush3.msra.mxu1 %v3363_v22 }
 0x89e   : > { %2619 = vmatprep.subr.mxu1 %v3086_v3 }
 0x89f   : > { %2620 = vmatpush3.msra.mxu1 %v3369_v23 }
 0x8a0   : > { %2621 = vmatprep.subr.mxu1 %v3086_v3 }
 0x8a1   : > { %2622 = vmatpush3.msra.mxu1 %v3373_v24 }
 0x8a2   : > { %2637 = vmatprep.subr.mxu1 %v3086_v3 }
 0x95a   : > { %v1555_v60 = vpop.f32.mrf.mxu1 }
 0x95b   : > { %v1559_v61 = vadd.f32 %v1555_v60, %v751_v59 }
 0x95c   : > { %v2603_v62 = vpop.f32.mrf.mxu1 }
 0x95d   : > { %2791 = vtanh.f32 %v1559_v61  ;;  %v2422_v0 = vmul.f32 -1.442695, %v1559_v61 }
 0x95f   : > { %2793 = vpow2.f32 %v2422_v0 }
 0x96a   : > { %v2792_v63 = vpop.eup %2791 }
 0x96b   : > { %1569 = vrot.lane.b32.xlu1 %v2792_v63, %s3088_s20 }
 0x96c   : > { %v2794_v1 = vpop.eup %2793 }
 0x96d   : > { %v1563_v5 = vadd.f32 1.0, %v2794_v1 }
 0x96f   : > { %2795 = vrcp.f32 %v1563_v5 }
 0x97c   : > { %v2796_v6 = vpop.eup %2795 }
 0x97d   : > { %v1567_v8 = vmul.f32 %v2796_v6, %v1439_v28  ;;  %v985_v28 = vadd.f32 %v3399_v34, %v3394_v32 }
 0x9dd   : > { %v1570_v2 = vpop.permute.xlu1 %1569 }
 0x9de   : > { %v1572_v7 = vmul.f32 %v2796_v6, %v1570_v2 }
 0x9e0   : > { %1574 = vrot.lane.b32.xlu0 %v1572_v7, %s3089_s1 }
 0xa52   : > { %v1575_v10 = vpop.permute.xlu0 %1574 }
 0xa53   : > { %v1577_v9 = vadd.f32 %v1575_v10, %v1567_v8 }
 0xa55   : > { %2797 = vtanh.f32 %v1577_v9 }
 0xa62   : > { %v2798_v12 = vpop.eup %2797 }
 0xa63   : > { %1580 = vrot.lane.b32.xlu1 %v2798_v12, %s3088_s20 }
 0xad5   : > { %v1581_v14 = vpop.permute.xlu1 %1580 }
 0xad6   : > { %v3519_v15 = vmul.f32 %v2796_v6, %v1581_v14 }
 0xad8   : > { %1623 = vrot.lane.b32.xlu0 %v3519_v15, %s3089_s1 }
 0xb4a   : > { %v1624_v16 = vpop.permute.xlu0 %1623 }
 0xb4b   : > { %2613 = vmatmul.mubr.msk.f32.vlgmr.msra.gmra.mxu0 %vm1066_vm4, %v1624_v16 }
 0xb4c   : > { %2627 = vmatpush3.msra.mxu0 %v3358_v21  ;;  %2634 = vmatprep.mubr.msk.f32.mxu0 %vm3087_vm1, %v3086_v3 }
 0xb4d   : > { %2628 = vmatprep.subr.mxu0 %v3086_v3 }
 0xb4e   : > { %2629 = vmatpush3.msra.mxu0 %v3363_v22 }
 0xb4f   : > { %2630 = vmatprep.subr.mxu0 %v3086_v3 }
 0xb50   : > { %2631 = vmatpush3.msra.mxu0 %v3369_v23 }
 0xb51   : > { %2632 = vmatprep.subr.mxu0 %v3086_v3 }
 0xb52   : > { %2633 = vmatpush3.msra.mxu0 %v3373_v24 }
 0xc0b   : > { %v1693_v18 = vpop.f32.mrf.mxu0 }
 0xc0c   : > { %v1697_v19 = vadd.f32 %v1693_v18, %v829_v17 }
 0xc0d   : > { %v2614_v20 = vpop.f32.mrf.mxu0 }
 0xc0e   : > { %2799 = vtanh.f32 %v1697_v19  ;;  %v2424_v26 = vmul.f32 -1.442695, %v1697_v19 }
 0xc10   : > { %2801 = vpow2.f32 %v2424_v26 }
 0xc1b   : > { %v2800_v25 = vpop.eup %2799 }
 0xc1c   : > { %1707 = vrot.lane.b32.xlu1 %v2800_v25, %s3088_s20  ;;  %v3090_v25 = vmov 1966171168  }
 0xc1d   : > { %v2802_v27 = vpop.eup %2801  ;;  %v1171_v26 = vunpack.c.l.s4 %v3090_v25 }
 0xc1e   : > { %v1701_v29 = vadd.f32 1.0, %v2802_v27  ;;  %v1173_v27 = vlaneseq }
 0xc20   : > { %2803 = vrcp.f32 %v1701_v29  ;;  %v1172_v29 = vunpack.c.0.s8 %v1171_v26 }
 0xc2d   : > { %v2804_v31 = vpop.eup %2803 }
 0xc2e   : > { %v1705_v36 = vmul.f32 %v2804_v31, %v1577_v9  ;;  %v1063_v9 = vadd.f32 %v3399_v34, %v3461_v13 }
 0xc8e   : > { %v1708_v33 = vpop.permute.xlu1 %1707 }
 0xc8f   : > { %v1710_v35 = vmul.f32 %v2804_v31, %v1708_v33 }
 0xc91   : > { %1712 = vrot.lane.b32.xlu0 %v1710_v35, %s3089_s1 }
 0xd03   : > { %v1713_v37 = vpop.permute.xlu0 %1712 }
 0xd04   : > { %v1715_v30 = vadd.f32 %v1713_v37, %v1705_v36 }
 0xd06   : > { %2805 = vtanh.f32 %v1715_v30 }
 0xd13   : > { %v2806_v38 = vpop.eup %2805 }
 0xd14   : > { %1718 = vrot.lane.b32.xlu1 %v2806_v38, %s3088_s20 }
 0xd86   : > { %v1719_v39 = vpop.permute.xlu1 %1718 }
 0xd87   : > { %v3538_v41 = vmul.f32 %v2804_v31, %v1719_v39  ;;  %v1174_v31 = vshrl.u32 %v1173_v27, 7 }
 0xd89   : > { %1761 = vrot.lane.b32.xlu0 %v3538_v41, %s3089_s1  ;;  %v3572_v33 = vsub.s32 %v1172_v29, %v1174_v31  ;;  %v3582_v38 = vsub.s32 0, %v1174_v31 }
 0xd8b   : > { %v1176_v34 = vrot.slane %v3453_v4, %v3572_v33  ;;  %v1315_v37 = vrot.slane %v3479_v40, %v3572_v33  ;;  %v1591_v40 = vrot.slane %v3519_v15, %v3572_v33 }
 0xd8d   : > { %v1184_v36 = vrot.slane %v1176_v34, %v3572_v33  ;;  %v1323_v39 = vrot.slane %v1315_v37, %v3572_v33 }
 0xd8f   : > { %v1195_v4 = vrot.slane %v1184_v36, %v3582_v38 }
 0xdfb   : > { %v1762_v42 = vpop.permute.xlu0 %1761 }
 0xdfc   : > { %2624 = vmatmul.mubr.msk.f32.vlgmr.msra.gmra.mxu1 %vm1066_vm4, %v1762_v42  ;;  %v1453_v42 = vrot.slane %v3499_v57, %v3572_v33 }
 0xdfd   : > { %2638 = vmatpush3.msra.mxu1 %v3358_v21  ;;  %2645 = vmatprep.mubr.msk.f32.mxu1 %vm3087_vm1, %v3086_v3 }
 0xdfe   : > { %2639 = vmatprep.subr.mxu1 %v3086_v3 }
 0xdff   : > { %2640 = vmatpush3.msra.mxu1 %v3363_v22 }
 0xe00   : > { %2641 = vmatprep.subr.mxu1 %v3086_v3 }
 0xe01   : > { %2642 = vmatpush3.msra.mxu1 %v3369_v23 }
 0xe02   : > { %2643 = vmatprep.subr.mxu1 %v3086_v3 }
 0xe03   : > { %2644 = vmatpush3.msra.mxu1 %v3373_v24 }
 0xebc   : > { %v1831_v44 = vpop.f32.mrf.mxu1 }
 0xebd   : > { %v1835_v21 = vadd.f32 %v1831_v44, %v907_v43  ;;  %v1461_v43 = vrot.slane %v1453_v42, %v3572_v33  ;;  %v1334_v44 = vrot.slane %v1323_v39, %v3582_v38 }
 0xebe   : > { %v2625_v45 = vpop.f32.mrf.mxu1 }
 0xebf   : > { %2807 = vtanh.f32 %v1835_v21  ;;  %v2426_v47 = vmul.f32 -1.442695, %v1835_v21  ;;  %v1599_v21 = vrot.slane %v1591_v40, %v3572_v33  ;;  %v1729_v45 = vrot.slane %v3538_v41, %v3572_v33 }
 0xec0   : > { %v1472_v57 = vrot.slane %v1461_v43, %v3582_v38 }
 0xec1   : > { %2809 = vpow2.f32 %v2426_v47  ;;  %v1610_v15 = vrot.slane %v1599_v21, %v3582_v38 }
 0xecc   : > { %v2808_v46 = vpop.eup %2807 }
 0xecd   : > { %1845 = vrot.lane.b32.xlu1 %v2808_v46, %s3088_s20  ;;  %v1737_v46 = vrot.slane %v1729_v45, %v3572_v33 }
 0xece   : > { %v2810_v22 = vpop.eup %2809 }
 0xecf   : > { %v1839_v48 = vadd.f32 1.0, %v2810_v22  ;;  %v1748_v41 = vrot.slane %v1737_v46, %v3582_v38 }
 0xed1   : > { %2811 = vrcp.f32 %v1839_v48 }
 0xede   : > { %v2812_v23 = vpop.eup %2811 }
 0xedf   : > { %v1843_v24 = vmul.f32 %v2812_v23, %v1715_v30 }
 0xf3f   : > { %v1846_v49 = vpop.permute.xlu1 %1845 }
 0xf40   : > { %v1848_v3 = vmul.f32 %v2812_v23, %v1846_v49 }
 0xf42   : > { %1850 = vrot.lane.b32.xlu0 %v1848_v3, %s3089_s1 }
 0xfb4   : > { %v1851_v50 = vpop.permute.xlu0 %1850 }
 0xfb5   : > { %v1853_v11 = vadd.f32 %v1851_v50, %v1843_v24 }
 0xfb7   : > { %2813 = vtanh.f32 %v1853_v11 }
 0xfc4   : > { %v2814_v51 = vpop.eup %2813 }
 0xfc5   : > { %1856 = vrot.lane.b32.xlu1 %v2814_v51, %s3088_s20 }
0x1037   : > { %v1857_v52 = vpop.permute.xlu1 %1856 }
0x1038   : > { %v3557_v53 = vmul.f32 %v2812_v23, %v1857_v52 }
0x103a   : > { %1899 = vrot.lane.b32.xlu0 %v3557_v53, %s3089_s1  ;;  %v1867_v47 = vrot.slane %v3557_v53, %v3572_v33  ;;  %v1177_v53 = vcombine.high %v1176_v34, %v1176_v34 }
0x103c   : > { %v1875_v22 = vrot.slane %v1867_v47, %v3572_v33 }
0x103e   : > { %v1886_v49 = vrot.slane %v1875_v22, %v3582_v38 }
0x10ac   : > { %v1900_v54 = vpop.permute.xlu0 %1899 }
0x10ad   : > { %2635 = vmatmul.mubr.msk.f32.vlgmr.msra.gmra.mxu0 %vm1066_vm4, %v1900_v54 }
0x116d   : > { %v1969_v55 = vpop.f32.mrf.mxu0 }
0x116e   : > { %v1973_v56 = vadd.f32 %v1969_v55, %v985_v28  ;;  %v1316_v28 = vcombine.high %v1315_v37, %v1315_v37  ;;  %v1191_v55 = vrot.slane %v1177_v53, %v3572_v33 }
0x116f   : > { %v2636_v58 = vpop.f32.mrf.mxu0 }
0x1170   : > { %2815 = vtanh.f32 %v1973_v56  ;;  %v2428_v60 = vmul.f32 -1.442695, %v1973_v56 }
0x1172   : > { %2817 = vpow2.f32 %v2428_v60  ;;  %v1199_v60 = vrot.slane %v1191_v55, %v3582_v38 }
0x117d   : > { %v2816_v59 = vpop.eup %2815 }
0x117e   : > { %1983 = vrot.lane.b32.xlu1 %v2816_v59, %s3088_s20  ;;  %v1454_v59 = vcombine.high %v1453_v42, %v1453_v42 }
0x117f   : > { %v2818_v61 = vpop.eup %2817 }
0x1180   : > { %v1977_v62 = vadd.f32 1.0, %v2818_v61  ;;  %v1330_v61 = vrot.slane %v1316_v28, %v3572_v33 }
0x1182   : > { %2819 = vrcp.f32 %v1977_v62 }
0x118f   : > { %v2820_v63 = vpop.eup %2819 }
0x1190   : > { %v1981_v5 = vmul.f32 %v2820_v63, %v1853_v11 }
0x11f0   : > { %v1984_v0 = vpop.permute.xlu1 %1983 }
0x11f1   : > { %v1986_v1 = vmul.f32 %v2820_v63, %v1984_v0  ;;  %v1338_v0 = vrot.slane %v1330_v61, %v3582_v38 }
0x11f3   : > { %1988 = vrot.lane.b32.xlu0 %v1986_v1, %s3089_s1  ;;  %v1468_v1 = vrot.slane %v1454_v59, %v3572_v33 }
0x1265   : > { %v1989_v6 = vpop.permute.xlu0 %1988 }
0x1266   : > { %v1991_v32 = vadd.f32 %v1989_v6, %v1981_v5  ;;  %v1730_v6 = vcombine.high %v1729_v45, %v1729_v45 }
0x1268   : > { %2821 = vtanh.f32 %v1991_v32 }
0x1275   : > { %v2822_v2 = vpop.eup %2821 }
0x1276   : > { %1994 = vrot.lane.b32.xlu1 %v2822_v2, %s3088_s20 }
0x12e8   : > { %v1995_v7 = vpop.permute.xlu1 %1994 }
0x12e9   : > { %v1997_v8 = vmul.f32 %v2820_v63, %v1995_v7  ;;  %v1592_v63 = vcombine.high %v1591_v40, %v1591_v40 }
0x12eb   : > { %2037 = vrot.lane.b32.xlu0 %v1997_v8, %s3089_s1  ;;  %v2005_v48 = vrot.slane %v1997_v8, %v3572_v33  ;;  %v1606_v2 = vrot.slane %v1592_v63, %v3572_v33  ;;  %v1868_v8 = vcombine.high %v1867_v47, %v1867_v47 }
0x12ed   : > { %v2013_v23 = vrot.slane %v2005_v48, %v3572_v33 }
0x12ef   : > { %v2024_v3 = vrot.slane %v2013_v23, %v3582_v38 }
0x135d   : > { %v2038_v10 = vpop.permute.xlu0 %2037 }
0x135e   : > { %2646 = vmatmul.mubr.msk.f32.vlgmr.msra.gmra.mxu1 %vm1066_vm4, %v2038_v10  ;;  %v1614_v10 = vrot.slane %v1606_v2, %v3582_v38 }
0x141e   : > { %v2107_v12 = vpop.f32.mrf.mxu1 }
0x141f   : > { %v2111_v14 = vadd.f32 %v2107_v12, %v1063_v9  ;;  %v1744_v9 = vrot.slane %v1730_v6, %v3572_v33  ;;  %v2006_v12 = vcombine.high %v2005_v48, %v2005_v48 }
0x1420   : > { %v2647_v16 = vpop.f32.mrf.mxu1 }
0x1421   : > { %2823 = vtanh.f32 %v2111_v14  ;;  %v2430_v18 = vmul.f32 -1.442695, %v2111_v14  ;;  %v1752_v14 = vrot.slane %v1744_v9, %v3582_v38  ;;  %v1882_v16 = vrot.slane %v1868_v8, %v3572_v33 }
0x1423   : > { %2825 = vpow2.f32 %v2430_v18  ;;  %v2020_v18 = vrot.slane %v2006_v12, %v3572_v33 }
0x142e   : > { %v2824_v17 = vpop.eup %2823 }
0x142f   : > { %2121 = vrot.lane.b32.xlu1 %v2824_v17, %s3088_s20  ;;  %v1890_v17 = vrot.slane %v1882_v16, %v3582_v38 }
0x1430   : > { %v2826_v19 = vpop.eup %2825 }
0x1431   : > { %v2115_v20 = vadd.f32 1.0, %v2826_v19  ;;  %v2028_v19 = vrot.slane %v2020_v18, %v3582_v38 }
0x1433   : > { %2827 = vrcp.f32 %v2115_v20 }
0x1440   : > { %v3576_v13 = vpop.eup %2827 }
0x1441   : > { %v2119_v24 = vmul.f32 %v3576_v13, %v1991_v32  ;;  %v1476_v32 = vrot.slane %v1468_v1, %v3582_v38 }
0x14a1   : > { %v2122_v35 = vpop.permute.xlu1 %2121 }
0x14a2   : > { %v2124_v30 = vmul.f32 %v3576_v13, %v2122_v35 }
0x14a4   : > { %2126 = vrot.lane.b32.xlu0 %v2124_v30, %s3089_s1 }
0x14a8   : > { %1200 = vrot.lane.b32.xlu0 %v1195_v4, %s3089_s1 }
0x14ac   : > { %1339 = vrot.lane.b32.xlu0 %v1334_v44, %s3089_s1 }
0x14b0   : > { %1477 = vrot.lane.b32.xlu0 %v1472_v57, %s3089_s1 }
0x14b4   : > { %1615 = vrot.lane.b32.xlu0 %v1610_v15, %s3089_s1 }
0x14b8   : > { %1753 = vrot.lane.b32.xlu0 %v1748_v41, %s3089_s1 }
0x14bc   : > { %1891 = vrot.lane.b32.xlu0 %v1886_v49, %s3089_s1 }
0x14c0   : > { %2029 = vrot.lane.b32.xlu0 %v2024_v3, %s3089_s1 }
0x1516   : > { %v2127_v50 = vpop.permute.xlu0 %2126 }
0x1517   : > { %v3615_v11 = vadd.f32 %v2127_v50, %v2119_v24 }
0x1519   : > { %2829 = vtanh.f32 %v3615_v11 }
0x151a   : > { %v1201_v51 = vpop.permute.xlu0 %1200 }
0x151b   : > { %1207 = vst.msk [vmem:[%s3303_s27] sm:$0x1] %vm1206_vm5, %v1201_v51 }
0x151e   : > { %v1340_v52 = vpop.permute.xlu0 %1339 }
0x151f   : > { %1345 = vst.msk [vmem:[%s3303_s27 + $0x1] sm:$0x1] %vm1206_vm5, %v1340_v52 }
0x1522   : > { %v1478_v54 = vpop.permute.xlu0 %1477 }
0x1523   : > { %1483 = vst.msk [vmem:[%s3303_s27 + $0x2] sm:$0x1] %vm1206_vm5, %v1478_v54 }
0x1526   : > { %v2830_v56 = vpop.eup %2829  ;;  %v1616_v58 = vpop.permute.xlu0 %1615 }
0x1527   : > { %1621 = vst.msk [vmem:[%s3303_s27 + $0x3] sm:$0x1] %vm1206_vm5, %v1616_v58  ;;  %2132 = vrot.lane.b32.xlu1 %v2830_v56, %s3088_s20 }
0x152a   : > { %v1754_v62 = vpop.permute.xlu0 %1753 }
0x152b   : > { %1759 = vst.msk [vmem:[%s3303_s27 + $0x4] sm:$0x1] %vm1206_vm5, %v1754_v62  ;;  %1202 = vrot.lane.b32.xlu1 %v1199_v60, %s3089_s1 }
0x152e   : > { %v1892_v5 = vpop.permute.xlu0 %1891 }
0x152f   : > { %1897 = vst.msk [vmem:[%s3303_s27 + $0x5] sm:$0x1] %vm1206_vm5, %v1892_v5  ;;  %1341 = vrot.lane.b32.xlu1 %v1338_v0, %s3089_s1 }
0x1532   : > { %v2030_v7 = vpop.permute.xlu0 %2029 }
0x1533   : > { %2035 = vst.msk [vmem:[%s3303_s27 + $0x6] sm:$0x1] %vm1206_vm5, %v2030_v7  ;;  %1479 = vrot.lane.b32.xlu1 %v1476_v32, %s3089_s1 }
0x1537   : > { %1617 = vrot.lane.b32.xlu1 %v1614_v10, %s3089_s1 }
0x153b   : > { %1755 = vrot.lane.b32.xlu1 %v1752_v14, %s3089_s1 }
0x153f   : > { %1893 = vrot.lane.b32.xlu1 %v1890_v17, %s3089_s1 }
0x1543   : > { %2031 = vrot.lane.b32.xlu1 %v2028_v19, %s3089_s1 }
0x1599   : > { %v2133_v20 = vpop.permute.xlu1 %2132 }
0x159a   : > { %v2135_v25 = vmul.f32 %v3576_v13, %v2133_v20 }
0x159c   : > { %v2143_v26 = vrot.slane %v2135_v25, %v3572_v33 }
0x159d   : > { %v1203_v27 = vpop.permute.xlu1 %1202 }
0x159e   : > { %v2144_v29 = vcombine.high %v2143_v26, %v2143_v26  ;;  %v2151_v31 = vrot.slane %v2143_v26, %v3572_v33  ;;  %1208 = vst.msk [vmem:[%s3303_s27 + $0x8] sm:$0x1] %vm1206_vm5, %v1203_v27 }
0x15a0   : > { %v2162_v34 = vrot.slane %v2151_v31, %v3582_v38  ;;  %v2158_v35 = vrot.slane %v2144_v29, %v3572_v33 }
0x15a1   : > { %v1342_v36 = vpop.permute.xlu1 %1341 }
0x15a2   : > { %1346 = vst.msk [vmem:[%s3303_s27 + $0x9] sm:$0x1] %vm1206_vm5, %v1342_v36  ;;  %2167 = vrot.lane.b32.xlu0 %v2162_v34, %s3089_s1  ;;  %v2166_v13 = vrot.slane %v2158_v35, %v3582_v38 }
0x15a4   : > { %2169 = vrot.lane.b32.xlu1 %v2166_v13, %s3089_s1 }
0x15a5   : > { %v1480_v37 = vpop.permute.xlu1 %1479 }
0x15a6   : > { %1484 = vst.msk [vmem:[%s3303_s27 + $0xa] sm:$0x1] %vm1206_vm5, %v1480_v37  ;;  %2175 = vrot.lane.b32.xlu0 %v2135_v25, %s3089_s1 }
0x15a8   : > { %2181 = vrot.lane.b32.xlu1 %v3615_v11, %s3091_s26 }
0x15a9   : > { %v1618_v33 = vpop.permute.xlu1 %1617 }
0x15aa   : > { %1622 = vst.msk [vmem:[%s3303_s27 + $0xb] sm:$0x1] %vm1206_vm5, %v1618_v33 }
0x15ad   : > { %v1756_v30 = vpop.permute.xlu1 %1755 }
0x15ae   : > { %1760 = vst.msk [vmem:[%s3303_s27 + $0xc] sm:$0x1] %vm1206_vm5, %v1756_v30 }
0x15b1   : > { %v1894_v39 = vpop.permute.xlu1 %1893 }
0x15b2   : > { %1898 = vst.msk [vmem:[%s3303_s27 + $0xd] sm:$0x1] %vm1206_vm5, %v1894_v39 }
0x15b5   : > { %v2032_v38 = vpop.permute.xlu1 %2031 }
0x15b6   : > { %2036 = vst.msk [vmem:[%s3303_s27 + $0xe] sm:$0x1] %vm1206_vm5, %v2032_v38 }
0x1614   : > { %v2168_v42 = vpop.permute.xlu0 %2167 }
0x1615   : > { %2173 = vst.msk [vmem:[%s3303_s27 + $0x7] sm:$0x1] %vm1206_vm5, %v2168_v42 }
0x1616   : > { %v2170_v4 = vpop.permute.xlu1 %2169 }
0x1617   : > { %2174 = vst.msk [vmem:[%s3303_s27 + $0xf] sm:$0x1] %vm1206_vm5, %v2170_v4  ;;  %2188 = sbr.rel (%p2431_p7) target bundleno = 5661 (0x161d), region = 68 }
0x1618   : > { %v2176_v43 = vpop.permute.xlu0 %2175 }
0x1619   : > { %2179 = vst.msk [vmem:[#allocation2] sm:$0x3] %vm2178_vm6, %v2176_v43 }
0x161a   : > { %v2182_v40 = vpop.permute.xlu1 %2181 }
0x161b   : > { %2184 = vst.msk [vmem:[#allocation3] sm:$0x3] %vm2178_vm6, %v2182_v40 }
0x161c   : > { %2189 = vst.msk [vmem:[#allocation13] sm:$0x3] %vm2178_vm6, %v2176_v43  ;;  %2190 = vst.msk [vmem:[#allocation15] sm:$0x3] %vm2178_vm6, %v2182_v40 }
0x161d PF: > { %s3092_s11 = smov [#allocation13]   ;;  %s2433_s25 = sshll.u32 %s3069_s30, 7 }
0x161e   : > { %s2223_s22 = sshll.u32 %s3092_s11, 4  ;;  %p3804_p8 = scmp.ne.s32.totalorder %s3787_s15, 0  ;;  %s2224_s22 = int_to_ptr.vmem [resolvable:$true] %s2223_s22 }
0x161f   : > { %s2937_s14 = scalar_lea.vmem %s2224_s22, 32  ;;  %p2944_p10 = scmp.lt.s32.totalorder %s2224_s22, %s2224_s22 }
0x1620   : > { %p2938_p1 = scmp.ne.s32.totalorder %s2224_s22, %s2937_s14  ;;  %p2945_p3 = scmp.lt.s32.totalorder %s2937_s14, %s2937_s14 }
0x1622   : > { %p2939_p9 = pnand %p2938_p1, %p3804_p8  ;;  %p2946_p5 = por %p2945_p3, %p2944_p10 }
0x1624   : > { %p2940_p11 = pneg %p2939_p9 }
0x1626   : > { %p2947_p6 = pnand %p2946_p5, %p2940_p11 }
0x1628   : > { %2950 = shalt.err (!%p2947_p6)
}
0x1629   : > { %2664 = dma.vmem_to_hbm [thread:$0]  (%p3804_p8), %s2224_s22, 32, %s3763_s7, [#allocation14]  }
0x162a   : > { %s3694_s4 = scalar_lea.hbm %s3762_s6, %s2433_s25  ;;  %s2207_s8 = sshll.u32 %s3303_s27, 4  ;;  %s3697_s8 = int_to_ptr.vmem [resolvable:$true] %s2207_s8 }
0x162b   : > { %s2192_s24 = scalar_lea.sflag [#allocation6], %s3285_s21  ;;  %s2961_s16 = scalar_lea.vmem %s3697_s8, 256 }
0x162c   : > { %p2962_p12 = scmp.ne.s32.totalorder %s3697_s8, %s2961_s16  ;;  %p3805_p13 = scmp.ne.s32.totalorder %s3789_s17, 0 }
0x162d   : > { %s3093_s19 = smov [#allocation12]  }
0x162e   : > { %p2963_p0 = pnand %p2962_p12, %p3805_p13  ;;  %s2965_s13 = sshll.u32 %s3093_s19, 4  ;;  %s2966_s13 = int_to_ptr.vmem [resolvable:$false] %s2965_s13 }
0x162f   : > { %s2967_s23 = scalar_lea.vmem %s2966_s13, 512  ;;  %p2968_p4 = scmp.lt.s32.totalorder %s3697_s8, %s2966_s13 }
0x1630   : > { %p2964_p2 = pneg %p2963_p0  ;;  %p2969_p7 = scmp.lt.s32.totalorder %s2967_s23, %s2961_s16 }
0x1632   : > { %p2970_p1 = por %p2969_p7, %p2968_p4 }
0x1634   : > { %p2971_p9 = pnand %p2970_p1, %p2964_p2 }
0x1636   : > { %2974 = shalt.err (!%p2971_p9)
}
0x1637   : > { %s2975_s27 = scalar_lea.hbm %s3694_s4, 256  ;;  %s2979_s26 = scalar_lea.hbm %s3762_s6, 512 }
0x1638   : > { %p2976_p11 = scmp.ne.s32.totalorder %s3694_s4, %s2975_s27  ;;  %p2980_p5 = scmp.lt.s32.totalorder %s3694_s4, %s3762_s6 }
0x1639   : > { %p2981_p6 = scmp.lt.s32.totalorder %s2979_s26, %s2975_s27 }
0x163a   : > { %p2977_p10 = pnand %p2976_p11, %p3805_p13 }
0x163b   : > { %p2982_p12 = por %p2981_p6, %p2980_p5 }
0x163c   : > { %p2978_p3 = pneg %p2977_p10 }
0x163e   : > { %p2983_p0 = pnand %p2982_p12, %p2978_p3 }
0x1640   : > { %2986 = shalt.err (!%p2983_p0)
}
0x1641   : > { %s3094_s25 = smov 128   ;;  %s3095_s14 = smov 256  }
0x1642   : > { %s3096_s3 = smov 8   ;;  %s3097_s10 = smov [#allocation15]  }
0x1643   : > { %2662 = dma.vmem_to_hbm [thread:$0]  (%p3805_p13), %s3697_s8, 256, %s3694_s4, %s2192_s24, %s3094_s25, %s3095_s14, %s3096_s3  }
0x1644   : > { %s2236_s30 = sshll.u32 %s3097_s10, 4  ;;  %s2237_s30 = int_to_ptr.vmem [resolvable:$true] %s2236_s30 }
0x1645   : > { %s2987_s18 = scalar_lea.vmem %s2237_s30, 32  ;;  %p2994_p1 = scmp.lt.s32.totalorder %s2237_s30, %s2237_s30 }
0x1646   : > { %p2988_p2 = scmp.ne.s32.totalorder %s2237_s30, %s2987_s18  ;;  %p2995_p9 = scmp.lt.s32.totalorder %s2987_s18, %s2987_s18 }
0x1648   : > { %p2989_p4 = pnand %p2988_p2, %p3804_p8  ;;  %p2996_p11 = por %p2995_p9, %p2994_p1 }
0x164a   : > { %p2990_p7 = pneg %p2989_p4 }
0x164c   : > { %p2997_p10 = pnand %p2996_p11, %p2990_p7 }
0x164e   : > { %3000 = shalt.err (!%p2997_p10)
}
0x164f   : > { %s3806_s17 = sld [smem:[#allocation28_spill]] }
0x1655   : > { %2666 = dma.vmem_to_hbm [thread:$0]  (%p3804_p8), %s2237_s30, 32, %s3806_s17, [#allocation14]  }
0x1656   : > { %3048 = dma.done.wait (%p3804_p8), [#allocation14], 64  }
0x1657   : > { %3050 = vsyncadd (%p3804_p8), [#allocation14], 4294967232 }
0x1658 PF: > { %s3807_s21 = sld [smem:[#allocation21_spill]] }
0x1659   : > { %s3808_s4 = sld [smem:[#allocation23_spill]] }
0x165a   : > { %s3809_s8 = sld [smem:[#allocation22_spill]] }
0x165e   : > { %s2256_s24 = sand.u32 1, %s3807_s21  }
0x165f   : > { %p3810_p13 = scmp.ne.s32.totalorder %s3808_s4, 0  ;;  %s2257_s13 = scalar_lea.sflag [#allocation6], %s2256_s24 }
0x1660   : > { %p3811_p3 = scmp.ge.s32.totalorder %s3809_s8, 2 }
0x1662   : > { %p2687_p5 = pnand %p3811_p3, %p3810_p13 }
0x1664   : > { %p2688_p6 = pneg %p2687_p5 }
0x1666   : > { %3052 = dma.done.wait (%p2688_p6), %s2257_s13, 256  }
0x1667   : > { %3054 = vsyncadd (%p2688_p6), %s2257_s13, 4294967040  ;;  %s28_s10 = sadd.s32 1, %s3809_s8   ;;  %s3812_s15 = sld [smem:[#allocation24_spill]] }
0x1668   : > { %p25_p12 = scmp.ge.s32.totalorder %s28_s10, 4   ;;  %s3813_s27 = smov %s3061_s28 }
0x1669   : > { %s3814_s28 = smov %s3065_s29  ;;  %s3815_s29 = smov %s3274_s12 }
0x166a   : > { %s3816_s30 = smov %s3073_s9  ;;  %27 = sbr.rel (!%p25_p12) target bundleno = 14 (0xe), region = 131 }
0x166d   : > { %s3817_s9 = smov %s3812_s15 }
0x166f   :  { %2262 = vsyncpa [#allocation5], 1 }
0x1670   :  { %2264 = vsyncpa [#allocation5 + $0x1], 1 }
0x1671   :  { %2265 = vsyncpa [#allocation8], 1 }
0x1672   :  { %2266 = vsyncpa [#allocation11], 1 }
0x1673   :  { %2267 = vsyncpa [#allocation6], 1 }
0x1674   :  { %2269 = vsyncpa [#allocation6 + $0x1], 1 }
0x1675   :  { %2270 = vsyncpa [#allocation14], 1 }

</bundles_post_ra>
